<compile_context>
chip_gen: v6e
topology: v6e:2x2x1
jax: 0.10.0
libtpu: 0.0.40
codegen_flags: <defaults>
</compile_context>

<pallas_src>
import math

import jax
import jax.numpy as jnp
from jax import lax
from jax.experimental import pallas as pl
from jax.experimental.pallas import tpu as pltpu


def _actor_rollout_kernel(
    x_ref, h0_ref, c0_ref,
    w1_ref, b1_ref,
    w2_ref, b2_ref,
    wih_ref, bihh_ref,
    whh_ref,
    w3_ref, b3_ref,
    dist_ref, h_ref, c_ref,
    gx_ref, hs_ref,
):
    TB = x_ref.shape[0]
    B, H = h0_ref.shape
    T = TB // B

    # ---- Batched (non-recurrent) trunk over all T*B rows ------------------
    x = jnp.dot(x_ref[...].astype(jnp.bfloat16), w1_ref[...],
                preferred_element_type=jnp.float32) + b1_ref[...]
    x = jnp.maximum(x, 0.0)
    x = jnp.dot(x.astype(jnp.bfloat16), w2_ref[...],
                preferred_element_type=jnp.float32) + b2_ref[...]
    x = jnp.maximum(x, 0.0)
    # Input-to-hidden gate preactivations for all steps; bih + bhh pre-folded.
    gx_ref[...] = jnp.dot(x.astype(jnp.bfloat16), wih_ref[...],
                          preferred_element_type=jnp.float32) + bihh_ref[...]

    # ---- Sequential LSTM recurrence (only the part that has to be serial) --
    def step(t, carry):
        h, c = carry
        row = pl.multiple_of(t * B, B)
        gates = gx_ref[pl.ds(row, B), :] + jnp.dot(
            h.astype(jnp.bfloat16), whh_ref[...],
            preferred_element_type=jnp.float32)
        # Full-vreg activations, then lane slices (PyTorch gate order i,f,g,o).
        sg = jax.nn.sigmoid(gates)
        tg = jnp.tanh(gates)
        i_g = sg[:, 0 * H:1 * H]
        f_g = sg[:, 1 * H:2 * H]
        g_g = tg[:, 2 * H:3 * H]
        o_g = sg[:, 3 * H:4 * H]
        c_new = f_g * c + i_g * g_g
        h_new = o_g * jnp.tanh(c_new)
        hs_ref[pl.ds(row, B), :] = h_new
        return h_new, c_new

    h_fin, c_fin = lax.fori_loop(0, T, step, (h0_ref[...], c0_ref[...]),
                                 unroll=True)
    h_ref[...] = h_fin
    c_ref[...] = c_fin

    # ---- Batched policy head + softmax (lane-dense store) ------------------
    logits = jnp.dot(hs_ref[...].astype(jnp.bfloat16), w3_ref[...],
                     preferred_element_type=jnp.float32) + b3_ref[...]
    logits = logits - jnp.max(logits, axis=1, keepdims=True)
    e = jnp.exp(logits)
    probs = e * pl.reciprocal(jnp.sum(e, axis=1, keepdims=True), approx=False)
    # clamp(max=1-1e-20) (no-op in fp32, kept for parity with the module)
    dist_ref[...] = jnp.minimum(probs, 1.0 - 1e-20)


def actor_rollout(states, h0, c0, params):
    """Fused T-step rollout in a single pallas_call.

    states: [T, B, S] f32;  h0, c0: [B, H] f32.
    Returns (dists [T, B, A], (h_T, c_T)).
    """
    T, B, S = states.shape
    H = h0.shape[1]
    A = params["w3"].shape[1]
    PAD = max(128, pl.cdiv(A, 128) * 128)   # lane-dense policy-head width

    bf16 = jnp.bfloat16
    w1 = params["w1"].astype(bf16)
    w2 = params["w2"].astype(bf16)
    wih = params["wih"].astype(bf16)
    whh = params["whh"].astype(bf16)
    w3p = jnp.zeros((H, PAD), bf16).at[:, :A].set(params["w3"].astype(bf16))
    b3p = jnp.full((1, PAD), -1e30, jnp.float32).at[:, :A].set(params["b3"])
    bihh = params["bih"] + params["bhh"]    # fold the two LSTM biases

    x_flat = states.reshape(T * B, S)       # trunk is batched over T*B rows

    vmem = pl.BlockSpec(memory_space=pltpu.MemorySpace.VMEM)

    dist_flat, h_new, c_new = pl.pallas_call(
        _actor_rollout_kernel,
        out_shape=(
            jax.ShapeDtypeStruct((T * B, PAD), jnp.float32),
            jax.ShapeDtypeStruct((B, H), jnp.float32),
            jax.ShapeDtypeStruct((B, H), jnp.float32),
        ),
        in_specs=[vmem] * 12,
        out_specs=(vmem, vmem, vmem),
        scratch_shapes=[
            pltpu.VMEM((T * B, 4 * H), jnp.float32),   # gate preactivations
            pltpu.VMEM((T * B, H), jnp.float32),       # per-step hidden states
        ],
        input_output_aliases={1: 1, 2: 2},   # h0 -> h_out, c0 -> c_out (P8)
    )(x_flat, h0, c0,
      w1, params["b1"], w2, params["b2"],
      wih, bihh, whh, w3p, b3p)

    dists = dist_flat.reshape(T, B, PAD)[:, :, :A]
    return dists, (h_new, c_new)


actor_rollout = jax.jit(actor_rollout)


def actor_forward(state, hidden_state, params):
    """Single-step forward, matching Actor.forward(state, hidden_state)."""
    h, c = hidden_state
    dist, (h_new, c_new) = actor_rollout(state[None], h, c, params)
    return dist[0], (h_new, c_new)


def init_actor_params(key, state_space, action_space, hidden_space):
    """Deterministic PyTorch-style uniform(-1/sqrt(fan_in), 1/sqrt(fan_in)) init.

    Weights stored as [in_features, out_features] (transposed from PyTorch)."""
    ks = jax.random.split(key, 10)

    def lin(kw, kb, fan_in, fan_out):
        bound = 1.0 / math.sqrt(fan_in)
        w = jax.random.uniform(kw, (fan_in, fan_out), jnp.float32, -bound, bound)
        b = jax.random.uniform(kb, (1, fan_out), jnp.float32, -bound, bound)
        return w, b

    w1, b1 = lin(ks[0], ks[1], state_space, 128)
    w2, b2 = lin(ks[2], ks[3], 128, hidden_space)
    # LSTMCell: weight_ih [4H, H], weight_hh [4H, H]; stored transposed [H, 4H].
    wih, bih = lin(ks[4], ks[5], hidden_space, 4 * hidden_space)
    whh, bhh = lin(ks[6], ks[7], hidden_space, 4 * hidden_space)
    w3, b3 = lin(ks[8], ks[9], hidden_space, action_space)
    return dict(w1=w1, b1=b1, w2=w2, b2=b2, wih=wih, bih=bih,
                whh=whh, bhh=bhh, w3=w3, b3=b3)


def _reference_rollout(states, h0, c0, p):
    """Pure-JAX reference (bf16 matmuls / f32 accumulate, like the kernel)."""
    def mm(a, w):
        return jnp.dot(a.astype(jnp.bfloat16), w.astype(jnp.bfloat16),
                       preferred_element_type=jnp.float32)

    H = h0.shape[1]

    def step(carry, s):
        h, c = carry
        x = jax.nn.relu(mm(s, p["w1"]) + p["b1"])
        x = jax.nn.relu(mm(x, p["w2"]) + p["b2"])
        gates = mm(x, p["wih"]) + p["bih"] + mm(h, p["whh"]) + p["bhh"]
        i = jax.nn.sigmoid(gates[:, 0 * H:1 * H])
        f = jax.nn.sigmoid(gates[:, 1 * H:2 * H])
        g = jnp.tanh(gates[:, 2 * H:3 * H])
        o = jax.nn.sigmoid(gates[:, 3 * H:4 * H])
        c_new = f * c + i * g
        h_new = o * jnp.tanh(c_new)
        dist = jnp.minimum(jax.nn.softmax(mm(h_new, p["w3"]) + p["b3"], axis=1),
                           1.0 - 1e-20)
        return (h_new, c_new), dist

    (hT, cT), dists = jax.lax.scan(step, (h0, c0), states)
    return dists, (hT, cT)


if __name__ == "__main__":
    T = 8               # fused rollout length
    B = 8               # batch
    STATE_SPACE = 16
    HIDDEN_SPACE = 32
    ACTION_SPACE = 8

    key = jax.random.PRNGKey(0)
    k_states, k_h, k_c, k_params = jax.random.split(key, 4)

    states = jax.random.normal(k_states, (T, B, STATE_SPACE), jnp.float32)
    h0 = jax.random.normal(k_h, (B, HIDDEN_SPACE), jnp.float32)
    c0 = jax.random.normal(k_c, (B, HIDDEN_SPACE), jnp.float32)
    params = init_actor_params(k_params, STATE_SPACE, ACTION_SPACE, HIDDEN_SPACE)

    # Fused T-step rollout: one pallas_call, weights + activations VMEM-resident.
    dists, (hT, cT) = actor_rollout(states, h0, c0, params)
    jax.block_until_ready((dists, hT, cT))

    # Single-step forward (original module semantics).
    dist1, (h1, c1) = actor_forward(states[0], (h0, c0), params)
    jax.block_until_ready((dist1, h1, c1))

    # Correctness checks against pure-JAX reference (bf16 matmuls => looser tol).
    dists_ref, (hT_ref, cT_ref) = _reference_rollout(states, h0, c0, params)
    assert dists.shape == (T, B, ACTION_SPACE)
    assert jnp.allclose(dists, dists_ref, atol=2e-3, rtol=2e-3)
    assert jnp.allclose(hT, hT_ref, atol=2e-3, rtol=2e-3)
    assert jnp.allclose(cT, cT_ref, atol=2e-3, rtol=2e-3)
    assert jnp.allclose(jnp.sum(dists, axis=-1), 1.0, atol=1e-5)
    assert jnp.allclose(dist1, dists_ref[0], atol=2e-3, rtol=2e-3)

    print("KERNEL_OK")
</pallas_src>

<mosaic_0001>
module attributes {stable_mosaic.version = 11 : i64} {
  func.func @_actor_rollout_kernel(%arg0: memref<64x16xf32, #tpu.memory_space<vmem>>, %arg1: memref<8x32xf32, #tpu.memory_space<vmem>>, %arg2: memref<8x32xf32, #tpu.memory_space<vmem>>, %arg3: memref<16x128xbf16, #tpu.memory_space<vmem>>, %arg4: memref<1x128xf32, #tpu.memory_space<vmem>>, %arg5: memref<128x32xbf16, #tpu.memory_space<vmem>>, %arg6: memref<1x32xf32, #tpu.memory_space<vmem>>, %arg7: memref<32x128xbf16, #tpu.memory_space<vmem>>, %arg8: memref<1x128xf32, #tpu.memory_space<vmem>>, %arg9: memref<32x128xbf16, #tpu.memory_space<vmem>>, %arg10: memref<32x128xbf16, #tpu.memory_space<vmem>>, %arg11: memref<1x128xf32, #tpu.memory_space<vmem>>, %arg12: memref<64x128xf32, #tpu.memory_space<vmem>>, %arg13: memref<8x32xf32, #tpu.memory_space<vmem>>, %arg14: memref<8x32xf32, #tpu.memory_space<vmem>>, %arg15: memref<64x128xf32, #tpu.memory_space<vmem>>, %arg16: memref<64x32xf32, #tpu.memory_space<vmem>>) attributes {dimension_semantics = [], scalar_prefetch = 0 : i64, scratch_operands = 2 : i64, tpu.core_type = #tpu.core_type<tc>} {
    %c0 = arith.constant 0 : index
    %c0_0 = arith.constant 0 : index
    %0 = vector.load %arg0[%c0, %c0_0] : memref<64x16xf32, #tpu.memory_space<vmem>>, vector<64x16xf32>
    %1 = arith.truncf %0 : vector<64x16xf32> to vector<64x16xbf16>
    %c0_1 = arith.constant 0 : index
    %c0_2 = arith.constant 0 : index
    %2 = vector.load %arg3[%c0_1, %c0_2] : memref<16x128xbf16, #tpu.memory_space<vmem>>, vector<16x128xbf16>
    %cst = arith.constant dense<0.000000e+00> : vector<64x128xf32>
    %3 = tpu.matmul %1, %2, %cst {dimension_numbers = #tpu.dot_dimension_numbers<[1], [0], [0], [1], [0, 0, 1, 1], [], []>} : vector<64x16xbf16>, vector<16x128xbf16>, vector<64x128xf32> -> vector<64x128xf32>
    %c0_3 = arith.constant 0 : index
    %c0_4 = arith.constant 0 : index
    %4 = vector.load %arg4[%c0_3, %c0_4] : memref<1x128xf32, #tpu.memory_space<vmem>>, vector<1x128xf32>
    %5 = vector.broadcast %4 : vector<1x128xf32> to vector<64x128xf32>
    %6 = arith.addf %3, %5 : vector<64x128xf32>
    %cst_5 = arith.constant 0.000000e+00 : f32
    %7 = vector.broadcast %cst_5 : f32 to vector<64x128xf32>
    %8 = arith.maximumf %6, %7 : vector<64x128xf32>
    %9 = arith.truncf %8 : vector<64x128xf32> to vector<64x128xbf16>
    %c0_6 = arith.constant 0 : index
    %c0_7 = arith.constant 0 : index
    %10 = vector.load %arg5[%c0_6, %c0_7] : memref<128x32xbf16, #tpu.memory_space<vmem>>, vector<128x32xbf16>
    %cst_8 = arith.constant dense<0.000000e+00> : vector<64x32xf32>
    %11 = tpu.matmul %9, %10, %cst_8 {dimension_numbers = #tpu.dot_dimension_numbers<[1], [0], [0], [1], [0, 0, 1, 1], [], []>} : vector<64x128xbf16>, vector<128x32xbf16>, vector<64x32xf32> -> vector<64x32xf32>
    %c0_9 = arith.constant 0 : index
    %c0_10 = arith.constant 0 : index
    %12 = vector.load %arg6[%c0_9, %c0_10] : memref<1x32xf32, #tpu.memory_space<vmem>>, vector<1x32xf32>
    %13 = vector.broadcast %12 : vector<1x32xf32> to vector<64x32xf32>
    %14 = arith.addf %11, %13 : vector<64x32xf32>
    %cst_11 = arith.constant 0.000000e+00 : f32
    %15 = vector.broadcast %cst_11 : f32 to vector<64x32xf32>
    %16 = arith.maximumf %14, %15 : vector<64x32xf32>
    %17 = arith.truncf %16 : vector<64x32xf32> to vector<64x32xbf16>
    %c0_12 = arith.constant 0 : index
    %c0_13 = arith.constant 0 : index
    %18 = vector.load %arg7[%c0_12, %c0_13] : memref<32x128xbf16, #tpu.memory_space<vmem>>, vector<32x128xbf16>
    %cst_14 = arith.constant dense<0.000000e+00> : vector<64x128xf32>
    %19 = tpu.matmul %17, %18, %cst_14 {dimension_numbers = #tpu.dot_dimension_numbers<[1], [0], [0], [1], [0, 0, 1, 1], [], []>} : vector<64x32xbf16>, vector<32x128xbf16>, vector<64x128xf32> -> vector<64x128xf32>
    %c0_15 = arith.constant 0 : index
    %c0_16 = arith.constant 0 : index
    %20 = vector.load %arg8[%c0_15, %c0_16] : memref<1x128xf32, #tpu.memory_space<vmem>>, vector<1x128xf32>
    %21 = vector.broadcast %20 : vector<1x128xf32> to vector<64x128xf32>
    %22 = arith.addf %19, %21 : vector<64x128xf32>
    %c0_17 = arith.constant 0 : index
    %c0_18 = arith.constant 0 : index
    %23 = vector.load %arg15[%c0_17, %c0_18] : memref<64x128xf32, #tpu.memory_space<vmem>>, vector<64x128xf32>
    tpu.vector_store %arg15[%c0_17, %c0_18], %22 {strides = array<i32>} : memref<64x128xf32, #tpu.memory_space<vmem>>, vector<64x128xf32>,
    %c0_19 = arith.constant 0 : index
    %c0_20 = arith.constant 0 : index
    %24 = vector.load %arg1[%c0_19, %c0_20] : memref<8x32xf32, #tpu.memory_space<vmem>>, vector<8x32xf32>
    %c0_21 = arith.constant 0 : index
    %c0_22 = arith.constant 0 : index
    %25 = vector.load %arg2[%c0_21, %c0_22] : memref<8x32xf32, #tpu.memory_space<vmem>>, vector<8x32xf32>
    %c0_i32 = arith.constant 0 : i32
    %c8_i32 = arith.constant 8 : i32
    %26 = arith.muli %c0_i32, %c8_i32 : i32
    %27 = tpu.assume_multiple %26, 8 : i32
    %28 = arith.index_cast %27 : i32 to index
    %c0_23 = arith.constant 0 : index
    %29 = vector.load %arg15[%28, %c0_23] : memref<64x128xf32, #tpu.memory_space<vmem>>, vector<8x128xf32>
    %30 = arith.truncf %24 : vector<8x32xf32> to vector<8x32xbf16>
    %c0_24 = arith.constant 0 : index
    %c0_25 = arith.constant 0 : index
    %31 = vector.load %arg9[%c0_24, %c0_25] : memref<32x128xbf16, #tpu.memory_space<vmem>>, vector<32x128xbf16>
    %cst_26 = arith.constant dense<0.000000e+00> : vector<8x128xf32>
    %32 = tpu.matmul %30, %31, %cst_26 {dimension_numbers = #tpu.dot_dimension_numbers<[1], [0], [0], [1], [0, 0, 1, 1], [], []>} : vector<8x32xbf16>, vector<32x128xbf16>, vector<8x128xf32> -> vector<8x128xf32>
    %33 = arith.addf %29, %32 : vector<8x128xf32>
    %34 = arith.negf %33 : vector<8x128xf32>
    %35 = math.exp %34 : vector<8x128xf32>
    %cst_27 = arith.constant 1.000000e+00 : f32
    %36 = vector.broadcast %cst_27 : f32 to vector<8x128xf32>
    %37 = arith.addf %36, %35 : vector<8x128xf32>
    %38 = arith.divf %36, %37 : vector<8x128xf32>
    %39 = math.tanh %33 : vector<8x128xf32>
    %40 = vector.extract_strided_slice %38 {offsets = [0, 0], sizes = [8, 32], strides = [1, 1]} : vector<8x128xf32> to vector<8x32xf32>
    %41 = vector.extract_strided_slice %38 {offsets = [0, 32], sizes = [8, 32], strides = [1, 1]} : vector<8x128xf32> to vector<8x32xf32>
    %42 = vector.extract_strided_slice %39 {offsets = [0, 64], sizes = [8, 32], strides = [1, 1]} : vector<8x128xf32> to vector<8x32xf32>
    %43 = vector.extract_strided_slice %38 {offsets = [0, 96], sizes = [8, 32], strides = [1, 1]} : vector<8x128xf32> to vector<8x32xf32>
    %44 = arith.mulf %41, %25 : vector<8x32xf32>
    %45 = arith.mulf %40, %42 : vector<8x32xf32>
    %46 = arith.addf %44, %45 : vector<8x32xf32>
    %47 = math.tanh %46 : vector<8x32xf32>
    %48 = arith.mulf %43, %47 : vector<8x32xf32>
    %49 = arith.index_cast %27 : i32 to index
    %c0_28 = arith.constant 0 : index
    %50 = vector.load %arg16[%49, %c0_28] : memref<64x32xf32, #tpu.memory_space<vmem>>, vector<8x32xf32>
    tpu.vector_store %arg16[%49, %c0_28], %48 {strides = array<i32>} : memref<64x32xf32, #tpu.memory_space<vmem>>, vector<8x32xf32>,
    %c1_i32 = arith.constant 1 : i32
    %c8_i32_29 = arith.constant 8 : i32
    %51 = arith.muli %c1_i32, %c8_i32_29 : i32
    %52 = tpu.assume_multiple %51, 8 : i32
    %53 = arith.index_cast %52 : i32 to index
    %c0_30 = arith.constant 0 : index
    %54 = vector.load %arg15[%53, %c0_30] : memref<64x128xf32, #tpu.memory_space<vmem>>, vector<8x128xf32>
    %55 = arith.truncf %48 : vector<8x32xf32> to vector<8x32xbf16>
    %c0_31 = arith.constant 0 : index
    %c0_32 = arith.constant 0 : index
    %56 = vector.load %arg9[%c0_31, %c0_32] : memref<32x128xbf16, #tpu.memory_space<vmem>>, vector<32x128xbf16>
    %cst_33 = arith.constant dense<0.000000e+00> : vector<8x128xf32>
    %57 = tpu.matmul %55, %56, %cst_33 {dimension_numbers = #tpu.dot_dimension_numbers<[1], [0], [0], [1], [0, 0, 1, 1], [], []>} : vector<8x32xbf16>, vector<32x128xbf16>, vector<8x128xf32> -> vector<8x128xf32>
    %58 = arith.addf %54, %57 : vector<8x128xf32>
    %59 = arith.negf %58 : vector<8x128xf32>
    %60 = math.exp %59 : vector<8x128xf32>
    %cst_34 = arith.constant 1.000000e+00 : f32
    %61 = vector.broadcast %cst_34 : f32 to vector<8x128xf32>
    %62 = arith.addf %61, %60 : vector<8x128xf32>
    %63 = arith.divf %61, %62 : vector<8x128xf32>
    %64 = math.tanh %58 : vector<8x128xf32>
    %65 = vector.extract_strided_slice %63 {offsets = [0, 0], sizes = [8, 32], strides = [1, 1]} : vector<8x128xf32> to vector<8x32xf32>
    %66 = vector.extract_strided_slice %63 {offsets = [0, 32], sizes = [8, 32], strides = [1, 1]} : vector<8x128xf32> to vector<8x32xf32>
    %67 = vector.extract_strided_slice %64 {offsets = [0, 64], sizes = [8, 32], strides = [1, 1]} : vector<8x128xf32> to vector<8x32xf32>
    %68 = vector.extract_strided_slice %63 {offsets = [0, 96], sizes = [8, 32], strides = [1, 1]} : vector<8x128xf32> to vector<8x32xf32>
    %69 = arith.mulf %66, %46 : vector<8x32xf32>
    %70 = arith.mulf %65, %67 : vector<8x32xf32>
    %71 = arith.addf %69, %70 : vector<8x32xf32>
    %72 = math.tanh %71 : vector<8x32xf32>
    %73 = arith.mulf %68, %72 : vector<8x32xf32>
    %74 = arith.index_cast %52 : i32 to index
    %c0_35 = arith.constant 0 : index
    %75 = vector.load %arg16[%74, %c0_35] : memref<64x32xf32, #tpu.memory_space<vmem>>, vector<8x32xf32>
    tpu.vector_store %arg16[%74, %c0_35], %73 {strides = array<i32>} : memref<64x32xf32, #tpu.memory_space<vmem>>, vector<8x32xf32>,
    %c2_i32 = arith.constant 2 : i32
    %c8_i32_36 = arith.constant 8 : i32
    %76 = arith.muli %c2_i32, %c8_i32_36 : i32
    %77 = tpu.assume_multiple %76, 8 : i32
    %78 = arith.index_cast %77 : i32 to index
    %c0_37 = arith.constant 0 : index
    %79 = vector.load %arg15[%78, %c0_37] : memref<64x128xf32, #tpu.memory_space<vmem>>, vector<8x128xf32>
    %80 = arith.truncf %73 : vector<8x32xf32> to vector<8x32xbf16>
    %c0_38 = arith.constant 0 : index
    %c0_39 = arith.constant 0 : index
    %81 = vector.load %arg9[%c0_38, %c0_39] : memref<32x128xbf16, #tpu.memory_space<vmem>>, vector<32x128xbf16>
    %cst_40 = arith.constant dense<0.000000e+00> : vector<8x128xf32>
    %82 = tpu.matmul %80, %81, %cst_40 {dimension_numbers = #tpu.dot_dimension_numbers<[1], [0], [0], [1], [0, 0, 1, 1], [], []>} : vector<8x32xbf16>, vector<32x128xbf16>, vector<8x128xf32> -> vector<8x128xf32>
    %83 = arith.addf %79, %82 : vector<8x128xf32>
    %84 = arith.negf %83 : vector<8x128xf32>
    %85 = math.exp %84 : vector<8x128xf32>
    %cst_41 = arith.constant 1.000000e+00 : f32
    %86 = vector.broadcast %cst_41 : f32 to vector<8x128xf32>
    %87 = arith.addf %86, %85 : vector<8x128xf32>
    %88 = arith.divf %86, %87 : vector<8x128xf32>
    %89 = math.tanh %83 : vector<8x128xf32>
    %90 = vector.extract_strided_slice %88 {offsets = [0, 0], sizes = [8, 32], strides = [1, 1]} : vector<8x128xf32> to vector<8x32xf32>
    %91 = vector.extract_strided_slice %88 {offsets = [0, 32], sizes = [8, 32], strides = [1, 1]} : vector<8x128xf32> to vector<8x32xf32>
    %92 = vector.extract_strided_slice %89 {offsets = [0, 64], sizes = [8, 32], strides = [1, 1]} : vector<8x128xf32> to vector<8x32xf32>
    %93 = vector.extract_strided_slice %88 {offsets = [0, 96], sizes = [8, 32], strides = [1, 1]} : vector<8x128xf32> to vector<8x32xf32>
    %94 = arith.mulf %91, %71 : vector<8x32xf32>
    %95 = arith.mulf %90, %92 : vector<8x32xf32>
    %96 = arith.addf %94, %95 : vector<8x32xf32>
    %97 = math.tanh %96 : vector<8x32xf32>
    %98 = arith.mulf %93, %97 : vector<8x32xf32>
    %99 = arith.index_cast %77 : i32 to index
    %c0_42 = arith.constant 0 : index
    %100 = vector.load %arg16[%99, %c0_42] : memref<64x32xf32, #tpu.memory_space<vmem>>, vector<8x32xf32>
    tpu.vector_store %arg16[%99, %c0_42], %98 {strides = array<i32>} : memref<64x32xf32, #tpu.memory_space<vmem>>, vector<8x32xf32>,
    %c3_i32 = arith.constant 3 : i32
    %c8_i32_43 = arith.constant 8 : i32
    %101 = arith.muli %c3_i32, %c8_i32_43 : i32
    %102 = tpu.assume_multiple %101, 8 : i32
    %103 = arith.index_cast %102 : i32 to index
    %c0_44 = arith.constant 0 : index
    %104 = vector.load %arg15[%103, %c0_44] : memref<64x128xf32, #tpu.memory_space<vmem>>, vector<8x128xf32>
    %105 = arith.truncf %98 : vector<8x32xf32> to vector<8x32xbf16>
    %c0_45 = arith.constant 0 : index
    %c0_46 = arith.constant 0 : index
    %106 = vector.load %arg9[%c0_45, %c0_46] : memref<32x128xbf16, #tpu.memory_space<vmem>>, vector<32x128xbf16>
    %cst_47 = arith.constant dense<0.000000e+00> : vector<8x128xf32>
    %107 = tpu.matmul %105, %106, %cst_47 {dimension_numbers = #tpu.dot_dimension_numbers<[1], [0], [0], [1], [0, 0, 1, 1], [], []>} : vector<8x32xbf16>, vector<32x128xbf16>, vector<8x128xf32> -> vector<8x128xf32>
    %108 = arith.addf %104, %107 : vector<8x128xf32>
    %109 = arith.negf %108 : vector<8x128xf32>
    %110 = math.exp %109 : vector<8x128xf32>
    %cst_48 = arith.constant 1.000000e+00 : f32
    %111 = vector.broadcast %cst_48 : f32 to vector<8x128xf32>
    %112 = arith.addf %111, %110 : vector<8x128xf32>
    %113 = arith.divf %111, %112 : vector<8x128xf32>
    %114 = math.tanh %108 : vector<8x128xf32>
    %115 = vector.extract_strided_slice %113 {offsets = [0, 0], sizes = [8, 32], strides = [1, 1]} : vector<8x128xf32> to vector<8x32xf32>
    %116 = vector.extract_strided_slice %113 {offsets = [0, 32], sizes = [8, 32], strides = [1, 1]} : vector<8x128xf32> to vector<8x32xf32>
    %117 = vector.extract_strided_slice %114 {offsets = [0, 64], sizes = [8, 32], strides = [1, 1]} : vector<8x128xf32> to vector<8x32xf32>
    %118 = vector.extract_strided_slice %113 {offsets = [0, 96], sizes = [8, 32], strides = [1, 1]} : vector<8x128xf32> to vector<8x32xf32>
    %119 = arith.mulf %116, %96 : vector<8x32xf32>
    %120 = arith.mulf %115, %117 : vector<8x32xf32>
    %121 = arith.addf %119, %120 : vector<8x32xf32>
    %122 = math.tanh %121 : vector<8x32xf32>
    %123 = arith.mulf %118, %122 : vector<8x32xf32>
    %124 = arith.index_cast %102 : i32 to index
    %c0_49 = arith.constant 0 : index
    %125 = vector.load %arg16[%124, %c0_49] : memref<64x32xf32, #tpu.memory_space<vmem>>, vector<8x32xf32>
    tpu.vector_store %arg16[%124, %c0_49], %123 {strides = array<i32>} : memref<64x32xf32, #tpu.memory_space<vmem>>, vector<8x32xf32>,
    %c4_i32 = arith.constant 4 : i32
    %c8_i32_50 = arith.constant 8 : i32
    %126 = arith.muli %c4_i32, %c8_i32_50 : i32
    %127 = tpu.assume_multiple %126, 8 : i32
    %128 = arith.index_cast %127 : i32 to index
    %c0_51 = arith.constant 0 : index
    %129 = vector.load %arg15[%128, %c0_51] : memref<64x128xf32, #tpu.memory_space<vmem>>, vector<8x128xf32>
    %130 = arith.truncf %123 : vector<8x32xf32> to vector<8x32xbf16>
    %c0_52 = arith.constant 0 : index
    %c0_53 = arith.constant 0 : index
    %131 = vector.load %arg9[%c0_52, %c0_53] : memref<32x128xbf16, #tpu.memory_space<vmem>>, vector<32x128xbf16>
    %cst_54 = arith.constant dense<0.000000e+00> : vector<8x128xf32>
    %132 = tpu.matmul %130, %131, %cst_54 {dimension_numbers = #tpu.dot_dimension_numbers<[1], [0], [0], [1], [0, 0, 1, 1], [], []>} : vector<8x32xbf16>, vector<32x128xbf16>, vector<8x128xf32> -> vector<8x128xf32>
    %133 = arith.addf %129, %132 : vector<8x128xf32>
    %134 = arith.negf %133 : vector<8x128xf32>
    %135 = math.exp %134 : vector<8x128xf32>
    %cst_55 = arith.constant 1.000000e+00 : f32
    %136 = vector.broadcast %cst_55 : f32 to vector<8x128xf32>
    %137 = arith.addf %136, %135 : vector<8x128xf32>
    %138 = arith.divf %136, %137 : vector<8x128xf32>
    %139 = math.tanh %133 : vector<8x128xf32>
    %140 = vector.extract_strided_slice %138 {offsets = [0, 0], sizes = [8, 32], strides = [1, 1]} : vector<8x128xf32> to vector<8x32xf32>
    %141 = vector.extract_strided_slice %138 {offsets = [0, 32], sizes = [8, 32], strides = [1, 1]} : vector<8x128xf32> to vector<8x32xf32>
    %142 = vector.extract_strided_slice %139 {offsets = [0, 64], sizes = [8, 32], strides = [1, 1]} : vector<8x128xf32> to vector<8x32xf32>
    %143 = vector.extract_strided_slice %138 {offsets = [0, 96], sizes = [8, 32], strides = [1, 1]} : vector<8x128xf32> to vector<8x32xf32>
    %144 = arith.mulf %141, %121 : vector<8x32xf32>
    %145 = arith.mulf %140, %142 : vector<8x32xf32>
    %146 = arith.addf %144, %145 : vector<8x32xf32>
    %147 = math.tanh %146 : vector<8x32xf32>
    %148 = arith.mulf %143, %147 : vector<8x32xf32>
    %149 = arith.index_cast %127 : i32 to index
    %c0_56 = arith.constant 0 : index
    %150 = vector.load %arg16[%149, %c0_56] : memref<64x32xf32, #tpu.memory_space<vmem>>, vector<8x32xf32>
    tpu.vector_store %arg16[%149, %c0_56], %148 {strides = array<i32>} : memref<64x32xf32, #tpu.memory_space<vmem>>, vector<8x32xf32>,
    %c5_i32 = arith.constant 5 : i32
    %c8_i32_57 = arith.constant 8 : i32
    %151 = arith.muli %c5_i32, %c8_i32_57 : i32
    %152 = tpu.assume_multiple %151, 8 : i32
    %153 = arith.index_cast %152 : i32 to index
    %c0_58 = arith.constant 0 : index
    %154 = vector.load %arg15[%153, %c0_58] : memref<64x128xf32, #tpu.memory_space<vmem>>, vector<8x128xf32>
    %155 = arith.truncf %148 : vector<8x32xf32> to vector<8x32xbf16>
    %c0_59 = arith.constant 0 : index
    %c0_60 = arith.constant 0 : index
    %156 = vector.load %arg9[%c0_59, %c0_60] : memref<32x128xbf16, #tpu.memory_space<vmem>>, vector<32x128xbf16>
    %cst_61 = arith.constant dense<0.000000e+00> : vector<8x128xf32>
    %157 = tpu.matmul %155, %156, %cst_61 {dimension_numbers = #tpu.dot_dimension_numbers<[1], [0], [0], [1], [0, 0, 1, 1], [], []>} : vector<8x32xbf16>, vector<32x128xbf16>, vector<8x128xf32> -> vector<8x128xf32>
    %158 = arith.addf %154, %157 : vector<8x128xf32>
    %159 = arith.negf %158 : vector<8x128xf32>
    %160 = math.exp %159 : vector<8x128xf32>
    %cst_62 = arith.constant 1.000000e+00 : f32
    %161 = vector.broadcast %cst_62 : f32 to vector<8x128xf32>
    %162 = arith.addf %161, %160 : vector<8x128xf32>
    %163 = arith.divf %161, %162 : vector<8x128xf32>
    %164 = math.tanh %158 : vector<8x128xf32>
    %165 = vector.extract_strided_slice %163 {offsets = [0, 0], sizes = [8, 32], strides = [1, 1]} : vector<8x128xf32> to vector<8x32xf32>
    %166 = vector.extract_strided_slice %163 {offsets = [0, 32], sizes = [8, 32], strides = [1, 1]} : vector<8x128xf32> to vector<8x32xf32>
    %167 = vector.extract_strided_slice %164 {offsets = [0, 64], sizes = [8, 32], strides = [1, 1]} : vector<8x128xf32> to vector<8x32xf32>
    %168 = vector.extract_strided_slice %163 {offsets = [0, 96], sizes = [8, 32], strides = [1, 1]} : vector<8x128xf32> to vector<8x32xf32>
    %169 = arith.mulf %166, %146 : vector<8x32xf32>
    %170 = arith.mulf %165, %167 : vector<8x32xf32>
    %171 = arith.addf %169, %170 : vector<8x32xf32>
    %172 = math.tanh %171 : vector<8x32xf32>
    %173 = arith.mulf %168, %172 : vector<8x32xf32>
    %174 = arith.index_cast %152 : i32 to index
    %c0_63 = arith.constant 0 : index
    %175 = vector.load %arg16[%174, %c0_63] : memref<64x32xf32, #tpu.memory_space<vmem>>, vector<8x32xf32>
    tpu.vector_store %arg16[%174, %c0_63], %173 {strides = array<i32>} : memref<64x32xf32, #tpu.memory_space<vmem>>, vector<8x32xf32>,
    %c6_i32 = arith.constant 6 : i32
    %c8_i32_64 = arith.constant 8 : i32
    %176 = arith.muli %c6_i32, %c8_i32_64 : i32
    %177 = tpu.assume_multiple %176, 8 : i32
    %178 = arith.index_cast %177 : i32 to index
    %c0_65 = arith.constant 0 : index
    %179 = vector.load %arg15[%178, %c0_65] : memref<64x128xf32, #tpu.memory_space<vmem>>, vector<8x128xf32>
    %180 = arith.truncf %173 : vector<8x32xf32> to vector<8x32xbf16>
    %c0_66 = arith.constant 0 : index
    %c0_67 = arith.constant 0 : index
    %181 = vector.load %arg9[%c0_66, %c0_67] : memref<32x128xbf16, #tpu.memory_space<vmem>>, vector<32x128xbf16>
    %cst_68 = arith.constant dense<0.000000e+00> : vector<8x128xf32>
    %182 = tpu.matmul %180, %181, %cst_68 {dimension_numbers = #tpu.dot_dimension_numbers<[1], [0], [0], [1], [0, 0, 1, 1], [], []>} : vector<8x32xbf16>, vector<32x128xbf16>, vector<8x128xf32> -> vector<8x128xf32>
    %183 = arith.addf %179, %182 : vector<8x128xf32>
    %184 = arith.negf %183 : vector<8x128xf32>
    %185 = math.exp %184 : vector<8x128xf32>
    %cst_69 = arith.constant 1.000000e+00 : f32
    %186 = vector.broadcast %cst_69 : f32 to vector<8x128xf32>
    %187 = arith.addf %186, %185 : vector<8x128xf32>
    %188 = arith.divf %186, %187 : vector<8x128xf32>
    %189 = math.tanh %183 : vector<8x128xf32>
    %190 = vector.extract_strided_slice %188 {offsets = [0, 0], sizes = [8, 32], strides = [1, 1]} : vector<8x128xf32> to vector<8x32xf32>
    %191 = vector.extract_strided_slice %188 {offsets = [0, 32], sizes = [8, 32], strides = [1, 1]} : vector<8x128xf32> to vector<8x32xf32>
    %192 = vector.extract_strided_slice %189 {offsets = [0, 64], sizes = [8, 32], strides = [1, 1]} : vector<8x128xf32> to vector<8x32xf32>
    %193 = vector.extract_strided_slice %188 {offsets = [0, 96], sizes = [8, 32], strides = [1, 1]} : vector<8x128xf32> to vector<8x32xf32>
    %194 = arith.mulf %191, %171 : vector<8x32xf32>
    %195 = arith.mulf %190, %192 : vector<8x32xf32>
    %196 = arith.addf %194, %195 : vector<8x32xf32>
    %197 = math.tanh %196 : vector<8x32xf32>
    %198 = arith.mulf %193, %197 : vector<8x32xf32>
    %199 = arith.index_cast %177 : i32 to index
    %c0_70 = arith.constant 0 : index
    %200 = vector.load %arg16[%199, %c0_70] : memref<64x32xf32, #tpu.memory_space<vmem>>, vector<8x32xf32>
    tpu.vector_store %arg16[%199, %c0_70], %198 {strides = array<i32>} : memref<64x32xf32, #tpu.memory_space<vmem>>, vector<8x32xf32>,
    %c7_i32 = arith.constant 7 : i32
    %c8_i32_71 = arith.constant 8 : i32
    %201 = arith.muli %c7_i32, %c8_i32_71 : i32
    %202 = tpu.assume_multiple %201, 8 : i32
    %203 = arith.index_cast %202 : i32 to index
    %c0_72 = arith.constant 0 : index
    %204 = vector.load %arg15[%203, %c0_72] : memref<64x128xf32, #tpu.memory_space<vmem>>, vector<8x128xf32>
    %205 = arith.truncf %198 : vector<8x32xf32> to vector<8x32xbf16>
    %c0_73 = arith.constant 0 : index
    %c0_74 = arith.constant 0 : index
    %206 = vector.load %arg9[%c0_73, %c0_74] : memref<32x128xbf16, #tpu.memory_space<vmem>>, vector<32x128xbf16>
    %cst_75 = arith.constant dense<0.000000e+00> : vector<8x128xf32>
    %207 = tpu.matmul %205, %206, %cst_75 {dimension_numbers = #tpu.dot_dimension_numbers<[1], [0], [0], [1], [0, 0, 1, 1], [], []>} : vector<8x32xbf16>, vector<32x128xbf16>, vector<8x128xf32> -> vector<8x128xf32>
    %208 = arith.addf %204, %207 : vector<8x128xf32>
    %209 = arith.negf %208 : vector<8x128xf32>
    %210 = math.exp %209 : vector<8x128xf32>
    %cst_76 = arith.constant 1.000000e+00 : f32
    %211 = vector.broadcast %cst_76 : f32 to vector<8x128xf32>
    %212 = arith.addf %211, %210 : vector<8x128xf32>
    %213 = arith.divf %211, %212 : vector<8x128xf32>
    %214 = math.tanh %208 : vector<8x128xf32>
    %215 = vector.extract_strided_slice %213 {offsets = [0, 0], sizes = [8, 32], strides = [1, 1]} : vector<8x128xf32> to vector<8x32xf32>
    %216 = vector.extract_strided_slice %213 {offsets = [0, 32], sizes = [8, 32], strides = [1, 1]} : vector<8x128xf32> to vector<8x32xf32>
    %217 = vector.extract_strided_slice %214 {offsets = [0, 64], sizes = [8, 32], strides = [1, 1]} : vector<8x128xf32> to vector<8x32xf32>
    %218 = vector.extract_strided_slice %213 {offsets = [0, 96], sizes = [8, 32], strides = [1, 1]} : vector<8x128xf32> to vector<8x32xf32>
    %219 = arith.mulf %216, %196 : vector<8x32xf32>
    %220 = arith.mulf %215, %217 : vector<8x32xf32>
    %221 = arith.addf %219, %220 : vector<8x32xf32>
    %222 = math.tanh %221 : vector<8x32xf32>
    %223 = arith.mulf %218, %222 : vector<8x32xf32>
    %224 = arith.index_cast %202 : i32 to index
    %c0_77 = arith.constant 0 : index
    %225 = vector.load %arg16[%224, %c0_77] : memref<64x32xf32, #tpu.memory_space<vmem>>, vector<8x32xf32>
    tpu.vector_store %arg16[%224, %c0_77], %223 {strides = array<i32>} : memref<64x32xf32, #tpu.memory_space<vmem>>, vector<8x32xf32>,
    %c8_i32_78 = arith.constant 8 : i32
    %c0_79 = arith.constant 0 : index
    %c0_80 = arith.constant 0 : index
    %226 = vector.load %arg13[%c0_79, %c0_80] : memref<8x32xf32, #tpu.memory_space<vmem>>, vector<8x32xf32>
    tpu.vector_store %arg13[%c0_79, %c0_80], %223 {strides = array<i32>} : memref<8x32xf32, #tpu.memory_space<vmem>>, vector<8x32xf32>,
    %c0_81 = arith.constant 0 : index
    %c0_82 = arith.constant 0 : index
    %227 = vector.load %arg14[%c0_81, %c0_82] : memref<8x32xf32, #tpu.memory_space<vmem>>, vector<8x32xf32>
    tpu.vector_store %arg14[%c0_81, %c0_82], %221 {strides = array<i32>} : memref<8x32xf32, #tpu.memory_space<vmem>>, vector<8x32xf32>,
    %c0_83 = arith.constant 0 : index
    %c0_84 = arith.constant 0 : index
    %228 = vector.load %arg16[%c0_83, %c0_84] : memref<64x32xf32, #tpu.memory_space<vmem>>, vector<64x32xf32>
    %229 = arith.truncf %228 : vector<64x32xf32> to vector<64x32xbf16>
    %c0_85 = arith.constant 0 : index
    %c0_86 = arith.constant 0 : index
    %230 = vector.load %arg10[%c0_85, %c0_86] : memref<32x128xbf16, #tpu.memory_space<vmem>>, vector<32x128xbf16>
    %cst_87 = arith.constant dense<0.000000e+00> : vector<64x128xf32>
    %231 = tpu.matmul %229, %230, %cst_87 {dimension_numbers = #tpu.dot_dimension_numbers<[1], [0], [0], [1], [0, 0, 1, 1], [], []>} : vector<64x32xbf16>, vector<32x128xbf16>, vector<64x128xf32> -> vector<64x128xf32>
    %c0_88 = arith.constant 0 : index
    %c0_89 = arith.constant 0 : index
    %232 = vector.load %arg11[%c0_88, %c0_89] : memref<1x128xf32, #tpu.memory_space<vmem>>, vector<1x128xf32>
    %233 = vector.broadcast %232 : vector<1x128xf32> to vector<64x128xf32>
    %234 = arith.addf %231, %233 : vector<64x128xf32>
    %cst_90 = arith.constant dense<0xFF800000> : vector<64xf32>
    %235 = vector.multi_reduction <maximumf>, %234, %cst_90 [1] : vector<64x128xf32> to vector<64xf32>
    %236 = vector.shape_cast %235 : vector<64xf32> to vector<64x1xf32>
    %237 = vector.broadcast %236 : vector<64x1xf32> to vector<64x128xf32>
    %238 = arith.subf %234, %237 : vector<64x128xf32>
    %239 = math.exp %238 : vector<64x128xf32>
    %cst_91 = arith.constant dense<0.000000e+00> : vector<64xf32>
    %240 = vector.multi_reduction <add>, %239, %cst_91 [1] : vector<64x128xf32> to vector<64xf32>
    %241 = vector.shape_cast %240 : vector<64xf32> to vector<64x1xf32>
    %242 = tpu.reciprocal %241 : vector<64x1xf32> -> vector<64x1xf32>
    %243 = vector.broadcast %242 : vector<64x1xf32> to vector<64x128xf32>
    %244 = arith.mulf %239, %243 : vector<64x128xf32>
    %cst_92 = arith.constant 1.000000e+00 : f32
    %245 = vector.broadcast %cst_92 : f32 to vector<64x128xf32>
    %246 = arith.minimumf %244, %245 : vector<64x128xf32>
    %c0_93 = arith.constant 0 : index
    %c0_94 = arith.constant 0 : index
    %247 = vector.load %arg12[%c0_93, %c0_94] : memref<64x128xf32, #tpu.memory_space<vmem>>, vector<64x128xf32>
    tpu.vector_store %arg12[%c0_93, %c0_94], %246 {strides = array<i32>} : memref<64x128xf32, #tpu.memory_space<vmem>>, vector<64x128xf32>,
    return
  }
}

</mosaic_0001>

<bundles_post_ra>
// kernel: actor_rollout.1
= control target key start
LH: loop header
LB: loop body
LE: loop exit
PB: predicated region body
PF: predicated region fallthrough
CT: control target
= control target key end

     0   :  { %vm73_vm0 = vcmask 130048   ;;  %s2185_s0 = inlined_call_operand.vmem [shape: f32[64,16], index: 0, kind: input, shape index: {}]   ;;  %s2186_s1 = inlined_call_operand.vmem [shape: f32[8,32], index: 1, kind: input, shape index: {}, may-alias: {1,13}]   ;;  %s2187_s2 = inlined_call_operand.vmem [shape: f32[8,32], index: 2, kind: input, shape index: {}, may-alias: {2,14}]   ;;  %s2188_s3 = inlined_call_operand.vmem [shape: bf16[16,128], index: 3, kind: input, shape index: {}]   ;;  %s2189_s4 = inlined_call_operand.vmem [shape: f32[1,128], index: 4, kind: input, shape index: {}]   ;;  %s2190_s5 = inlined_call_operand.vmem [shape: bf16[128,32], index: 5, kind: input, shape index: {}]   ;;  %s2191_s6 = inlined_call_operand.vmem [shape: f32[1,32], index: 6, kind: input, shape index: {}]   ;;  %s2192_s7 = inlined_call_operand.vmem [shape: bf16[32,128], index: 7, kind: input, shape index: {}]   ;;  %s2193_s8 = inlined_call_operand.vmem [shape: f32[1,128], index: 8, kind: input, shape index: {}]   ;;  %s2194_s9 = inlined_call_operand.vmem [shape: bf16[32,128], index: 9, kind: input, shape index: {}]   ;;  %s2195_s10 = inlined_call_operand.vmem [shape: bf16[32,128], index: 10, kind: input, shape index: {}]   ;;  %s2196_s11 = inlined_call_operand.vmem [shape: f32[1,128], index: 11, kind: input, shape index: {}]   ;;  %s2197_s12 = inlined_call_operand.hbm [shape: f32[64,128], index: 12, kind: output, shape index: {0}]   ;;  %s2198_s13 = inlined_call_operand.vmem [shape: f32[8,32], index: 13, kind: output, shape index: {1}, may-alias: {1,13}]   ;;  %s2199_s14 = inlined_call_operand.vmem [shape: f32[8,32], index: 14, kind: output, shape index: {2}, may-alias: {2,14}]  }
   0x1   :  { %v1663_v0 = vld [vmem:[%s2188_s3] sm:$0xff]   ;;  %v47_v2 = vld [vmem:[%s2185_s0 + $0x8] sm:$0xff]  ;;  %v48_v3 = vld [vmem:[%s2185_s0 + $0x10] sm:$0xff] }
   0x2   :  { %v46_v1 = vld [vmem:[%s2185_s0] sm:$0xff]  ;;  %1533 = vmatprep.subr.bf16.mxu0 %v1663_v0  ;;  %v49_v5 = vld [vmem:[%s2185_s0 + $0x18] sm:$0xff]  ;;  %v51_v7 = vld [vmem:[%s2185_s0 + $0x28] sm:$0xff] }
   0x3   :  { %v54_v4 = vpack.c.bf16 %v47_v2, %v46_v1  ;;  %v50_v6 = vld [vmem:[%s2185_s0 + $0x20] sm:$0xff]  ;;  %1534 = vmatpush3.bf16.msra.mxu0 %v1663_v0  ;;  %v55_v8 = vpack.c.bf16 %v49_v5, %v48_v3  ;;  %v1664_v10 = vld [vmem:[%s2190_s5 + $0x38] sm:$0xff]   ;;  %v1665_v11 = vld [vmem:[%s2190_s5 + $0x30] sm:$0xff]  }
   0x4   :  { %v56_v9 = vpack.c.bf16 %v51_v7, %v50_v6  ;;  %v52_v12 = vld [vmem:[%s2185_s0 + $0x30] sm:$0xff]  ;;  %1543 = vmatprep.subr.bf16.mxu1 %v1664_v10  ;;  %v53_v13 = vld [vmem:[%s2185_s0 + $0x38] sm:$0xff]  ;;  %v1666_v14 = vld [vmem:[%s2190_s5 + $0x28] sm:$0xff]  }
   0x5   :  { %1535 = vmatprep.mubr.msk.bf16.mxu0 %vm73_vm0, %v54_v4  ;;  %1544 = vmatpush3.bf16.msra.mxu1 %v1664_v10  ;;  %v57_v15 = vpack.c.bf16 %v53_v13, %v52_v12  ;;  %v1667_v16 = vld [vmem:[%s2190_s5 + $0x20] sm:$0xff]   ;;  %v1668_v17 = vld [vmem:[%s2190_s5 + $0x18] sm:$0xff]  }
   0x6   :  { %1536 = vmatmul.mubr.msk.bf16.vlgmr.msra.gmra.mxu0 %vm73_vm0, %v55_v8  ;;  %1545 = vmatprep.subr.bf16.mxu1 %v1665_v11 }
   0x7   :  { %1539 = vmatprep.mubr.msk.bf16.mxu0 %vm73_vm0, %v56_v9 }
   0x9   :  { %1546 = vmatpush3.bf16.msra.mxu1 %v1665_v11 }
   0xa   :  { %1547 = vmatprep.subr.bf16.mxu1 %v1666_v14 }
   0xd   :  { %1548 = vmatpush3.bf16.msra.mxu1 %v1666_v14 }
   0xe   :  { %1540 = vmatmul.mubr.msk.bf16.gmra.mxu0 %vm73_vm0, %v57_v15  ;;  %1549 = vmatprep.subr.bf16.mxu1 %v1667_v16 }
  0x11   :  { %1550 = vmatpush3.bf16.msra.mxu1 %v1667_v16 }
  0x12   :  { %1551 = vmatprep.subr.bf16.mxu1 %v1668_v17 }
  0x15   :  { %1552 = vmatpush3.bf16.msra.mxu1 %v1668_v17 }
  0x16   :  { %20 = vsyncpa [#allocation5], 0  ;;  %v1669_v18 = vld [vmem:[%s2190_s5 + $0x10] sm:$0xff]   ;;  %v1670_v19 = vld [vmem:[%s2190_s5 + $0x8] sm:$0xff]   ;;  %v1810_v52 = vmov 0.0   ;;  %vm1811_vm1 = vmmov 0  }
  0x17   :  { %1553 = vmatprep.subr.bf16.mxu1 %v1669_v18  ;;  %v1671_v20 = vld [vmem:[%s2190_s5] sm:$0xff]   ;;  %v1672_v21 = vld [vmem:[%s2192_s7 + $0x8] sm:$0xff]   ;;  %vm334_vm2 = vcmask 261120   ;;  %s1813_s23 = smov 32   ;;  %s1815_s5 = smov [#allocation4]  }
  0x18   :  { %1567 = vmatprep.subr.bf16.mxu0 %v1672_v21  ;;  %v1419_v24 = vld [vmem:[%s2189_s4] ss:$0 sm:$0xff]  ;;  %v1674_v5 = vld [vmem:[%s2194_s9 + $0x8] sm:$0xff]   ;;  %s1400_s16 = sshll.u32 %s1815_s5, 4  ;;  %s1401_s16 = int_to_ptr.vmem [resolvable:$true] %s1400_s16 }
  0x19   :  { %1554 = vmatpush3.bf16.msra.mxu1 %v1669_v18  ;;  %1568 = vmatpush3.bf16.msra.mxu0 %v1672_v21  ;;  %v1673_v51 = vld [vmem:[%s2192_s7] sm:$0xff]   ;;  %p1793_p1 = scmp.lt.s32.totalorder %s1401_s16, %s1401_s16 }
  0x1a   :  { %1555 = vmatprep.subr.bf16.mxu1 %v1670_v19  ;;  %1569 = vmatprep.subr.bf16.mxu0 %v1673_v51  ;;  %v1425_v55 = vld [vmem:[%s2191_s6] ss:$0 sm:$0xff] }
  0x1b   :  { %v1675_v13 = vld [vmem:[%s2194_s9] sm:$0xff]  }
  0x1d   :  { %1556 = vmatpush3.bf16.msra.mxu1 %v1670_v19  ;;  %1570 = vmatpush3.bf16.msra.mxu0 %v1673_v51 }
  0x1e   :  { %1557 = vmatprep.subr.bf16.mxu1 %v1671_v20  ;;  %1579 = vmatprep.subr.bf16.mxu0 %v1810_v52 }
  0x21   :  { %1558 = vmatpush3.bf16.msra.mxu1 %v1671_v20  ;;  %v420_v20 = vld [vmem:[%s2186_s1] sm:$0xff]  ;;  %s1812_s1 = smov 64  }
  0x22   :  { %1611 = vmatprep.subr.bf16.mxu1 %v1810_v52  ;;  %v423_v21 = vpack.c.bf16 %v420_v20, %v420_v20 }
  0xc6   :  { %v1537_v22 = vpop.f32.mrf.mxu0 }
  0xc7   :  { %v129_v28 = vadd.f32 %v1537_v22, %v1419_v24  ;;  %v1434_v22 = vld [vmem:[%s2193_s8] ss:$0 sm:$0xff] }
  0xc8   :  { %v120_v23 = vpop.f32.mrf.mxu0 }
  0xc9   :  { %v121_v26 = vadd.f32 %v1419_v24, %v120_v23  ;;  %v153_v35 = vmax.f32 %v129_v28, 0.0 }
  0xca   :  { %v1538_v25 = vpop.f32.mrf.mxu0 }
  0xcb   :  { %v132_v27 = vadd.f32 %v1538_v25, %v1419_v24  ;;  %v151_v33 = vmax.f32 %v121_v26, 0.0 }
  0xcc   :  { %v123_v29 = vpop.f32.mrf.mxu0 }
  0xcd   :  { %v124_v30 = vadd.f32 %v1419_v24, %v123_v29  ;;  %v154_v31 = vmax.f32 %v132_v27, 0.0 }
  0xce   :  { %v1541_v32 = vpop.f32.mrf.mxu0 }
  0xcf   :  { %v152_v34 = vmax.f32 %v124_v30, 0.0  ;;  %v160_v38 = vpack.c.bf16 %v154_v31, %v153_v35  ;;  %v145_v42 = vadd.f32 %v1541_v32, %v1419_v24 }
  0xd0   :  { %v136_v36 = vpop.f32.mrf.mxu0 }
  0xd1   :  { %v159_v37 = vpack.c.bf16 %v152_v34, %v151_v33  ;;  %v137_v40 = vadd.f32 %v1419_v24, %v136_v36  ;;  %v157_v48 = vmax.f32 %v145_v42, 0.0 }
  0xd2   :  { %v1542_v39 = vpop.f32.mrf.mxu0 }
  0xd3   :  { %v148_v41 = vadd.f32 %v1542_v39, %v1419_v24  ;;  %1559 = vmatprep.mubr.bf16.mxu1 %v159_v37  ;;  %v155_v46 = vmax.f32 %v137_v40, 0.0 }
  0xd4   :  { %v139_v43 = vpop.f32.mrf.mxu0  ;;  %1560 = vmatmul.mubr.bf16.vlgmr.msra.gmra.mxu1 %v160_v38 }
  0xd5   :  { %v140_v44 = vadd.f32 %v1419_v24, %v139_v43  ;;  %v158_v45 = vmax.f32 %v148_v41, 0.0 }
  0xd7   :  { %v156_v47 = vmax.f32 %v140_v44, 0.0  ;;  %v162_v50 = vpack.c.bf16 %v158_v45, %v157_v48  ;;  %v421_v45 = vld [vmem:[%s2187_s2] sm:$0xff] }
  0xd9   :  { %v161_v49 = vpack.c.bf16 %v156_v47, %v155_v46 }
  0xdb   :  { %1563 = vmatprep.mubr.bf16.mxu1 %v161_v49 }
  0xdc   :  { %1564 = vmatmul.mubr.bf16.gmra.mxu1 %v162_v50 }
  0xdd   :  { %1615 = vmatprep.mubr.msk.bf16.mxu1 %vm1811_vm1, %v1810_v52 }
 0x194   :  { %v1561_v53 = vpop.f32.mrf.mxu1 }
 0x195   :  { %v277_v59 = vadd.f32 %v1561_v53, %v1425_v55 }
 0x196   :  { %v268_v54 = vpop.f32.mrf.mxu1 }
 0x197   :  { %v269_v57 = vadd.f32 %v1425_v55, %v268_v54  ;;  %v301_v2 = vmax.f32 %v277_v59, 0.0 }
 0x198   :  { %v1562_v56 = vpop.f32.mrf.mxu1 }
 0x199   :  { %v280_v58 = vadd.f32 %v1562_v56, %v1425_v55  ;;  %v299_v0 = vmax.f32 %v269_v57, 0.0  ;;  %v1676_v57 = vld [vmem:[%s2194_s9 + $0x8] sm:$0xff]  }
 0x19a   :  { %v271_v60 = vpop.f32.mrf.mxu1 }
 0x19b   :  { %v272_v61 = vadd.f32 %v1425_v55, %v271_v60  ;;  %v302_v62 = vmax.f32 %v280_v58, 0.0  ;;  %v1677_v58 = vld [vmem:[%s2194_s9] sm:$0xff]  }
 0x19c   :  { %v1565_v63 = vpop.f32.mrf.mxu1 }
 0x19d   :  { %v300_v1 = vmax.f32 %v272_v61, 0.0  ;;  %v308_v6 = vpack.c.bf16 %v302_v62, %v301_v2  ;;  %v293_v10 = vadd.f32 %v1565_v63, %v1425_v55 }
 0x19e   :  { %v284_v3 = vpop.f32.mrf.mxu1 }
 0x19f   :  { %v307_v4 = vpack.c.bf16 %v300_v1, %v299_v0  ;;  %v285_v8 = vadd.f32 %v1425_v55, %v284_v3  ;;  %v305_v17 = vmax.f32 %v293_v10, 0.0 }
 0x1a0   :  { %v1566_v7 = vpop.f32.mrf.mxu1 }
 0x1a1   :  { %v296_v9 = vadd.f32 %v1566_v7, %v1425_v55  ;;  %1571 = vmatprep.mubr.msk.bf16.mxu0 %vm334_vm2, %v307_v4  ;;  %v303_v15 = vmax.f32 %v285_v8, 0.0 }
 0x1a2   :  { %v287_v11 = vpop.f32.mrf.mxu1  ;;  %1572 = vmatmul.mubr.msk.bf16.vlgmr.msra.gmra.mxu0 %vm334_vm2, %v308_v6 }
 0x1a3   :  { %v288_v12 = vadd.f32 %v1425_v55, %v287_v11  ;;  %1580 = vmatpush3.bf16.msra.mxu0 %v1674_v5  ;;  %v306_v14 = vmax.f32 %v296_v9, 0.0 }
 0x1a4   :  { %1581 = vmatprep.subr.bf16.mxu0 %v1810_v52 }
 0x1a5   :  { %v304_v16 = vmax.f32 %v288_v12, 0.0  ;;  %v310_v19 = vpack.c.bf16 %v306_v14, %v305_v17 }
 0x1a7   :  { %v309_v18 = vpack.c.bf16 %v304_v16, %v303_v15  ;;  %1582 = vmatpush3.bf16.msra.mxu0 %v1675_v13  ;;  %v1678_v15 = vld [vmem:[%s2194_s9 + $0x8] sm:$0xff]   ;;  %v1679_v16 = vld [vmem:[%s2194_s9] sm:$0xff]  }
 0x1a8   :  { %1587 = vmatprep.subr.bf16.mxu0 %v1810_v52 }
 0x1a9   :  { %1575 = vmatprep.mubr.msk.bf16.mxu0 %vm334_vm2, %v309_v18 }
 0x1aa   :  { %1576 = vmatmul.mubr.msk.bf16.gmra.mxu0 %vm334_vm2, %v310_v19 }
 0x1ab   :  { %1583 = vmatprep.mubr.msk.bf16.mxu0 %vm1811_vm1, %v1810_v52 }
 0x1b2   :  { %1584 = vmatmul.mubr.msk.bf16.vlgmr.msra.gmra.mxu0 %vm334_vm2, %v423_v21 }
 0x1b3   :  { %1591 = vmatprep.mubr.msk.bf16.mxu0 %vm1811_vm1, %v1810_v52  ;;  %1588 = vmatpush3.bf16.msra.mxu0 %v1676_v57 }
 0x1b4   :  { %1589 = vmatprep.subr.bf16.mxu0 %v1810_v52 }
 0x1b7   :  { %1590 = vmatpush3.bf16.msra.mxu0 %v1677_v58 }
 0x1b8   :  { %1595 = vmatprep.subr.bf16.mxu0 %v1810_v52 }
 0x262   :  { %v1573_v23 = vpop.f32.mrf.mxu0 }
 0x263   :  { %v1987_v24 = vadd.f32 %v1573_v23, %v1434_v22 }
 0x264   :  { %v381_v25 = vpop.f32.mrf.mxu0 }
 0x265   :  { %v382_v37 = vadd.f32 %v1434_v22, %v381_v25 }
 0x266   :  { %v1574_v26 = vpop.f32.mrf.mxu0 }
 0x267   :  { %v1989_v27 = vadd.f32 %v1574_v26, %v1434_v22 }
 0x268   :  { %v384_v28 = vpop.f32.mrf.mxu0 }
 0x269   :  { %v385_v29 = vadd.f32 %v1434_v22, %v384_v28 }
 0x26a   :  { %v1577_v30 = vpop.f32.mrf.mxu0 }
 0x26b   :  { %v1991_v31 = vadd.f32 %v1577_v30, %v1434_v22 }
 0x26c   :  { %v397_v32 = vpop.f32.mrf.mxu0 }
 0x26d   :  { %v1993_v33 = vadd.f32 %v1434_v22, %v397_v32 }
 0x26e   :  { %v1578_v34 = vpop.f32.mrf.mxu0 }
 0x26f   :  { %v1995_v35 = vadd.f32 %v1578_v34, %v1434_v22 }
 0x270   :  { %v400_v36 = vpop.f32.mrf.mxu0 }
 0x271   :  { %v1997_v38 = vadd.f32 %v1434_v22, %v400_v36 }
 0x272   :  { %v477_v39 = vpop.f32.mrf.mxu0 }
 0x273   :  { %v483_v40 = vadd.f32 %v477_v39, %v382_v37 }
 0x274   :  { %v1585_v41 = vpop.f32.mrf.mxu0 }
 0x275   :  { %1692 = vtanh.f32 %v483_v40  ;;  %v1444_v46 = vmul.f32 -1.442695, %v483_v40 }
 0x276   :  { %v480_v42 = vpop.f32.mrf.mxu0 }
 0x277   :  { %1694 = vpow2.f32 %v1444_v46  ;;  %v1680_v42 = vld [vmem:[%s2194_s9 + $0x8] sm:$0xff]  }
 0x278   :  { %v1586_v43 = vpop.f32.mrf.mxu0 }
 0x279   :  { %v1681_v43 = vld [vmem:[%s2194_s9] sm:$0xff]  }
 0x282   :  { %v1693_v44 = vpop.eup %1692 }
 0x283   :  { %497 = vrot.lane.b32.xlu0 %v1693_v44, %s1812_s1 }
 0x284   :  { %v1695_v47 = vpop.eup %1694 }
 0x285   :  { %v487_v48 = vadd.f32 1.0, %v1695_v47 }
 0x287   :  { %492 = vrot.lane.b32.xlu0 %v421_v45, %s1813_s23  ;;  %1696 = vrcp.f32 %v487_v48 }
 0x294   :  { %v1697_v49 = vpop.eup %1696 }
 0x2f5   :  { %v498_v50 = vpop.permute.xlu0 %497 }
 0x2f6   :  { %v500_v51 = vmul.f32 %v1697_v49, %v498_v50 }
 0x2f8   :  { %502 = vrot.lane.b32.xlu1 %v500_v51, %s1813_s23 }
 0x2f9   :  { %v493_v53 = vpop.permute.xlu0 %492 }
 0x2fa   :  { %v495_v54 = vmul.f32 %v1697_v49, %v493_v53 }
 0x36a   :  { %v503_v55 = vpop.permute.xlu1 %502 }
 0x36b   :  { %v505_v56 = vadd.f32 %v503_v55, %v495_v54 }
 0x36d   :  { %1698 = vtanh.f32 %v505_v56 }
 0x37a   :  { %v1699_v59 = vpop.eup %1698 }
 0x37b   :  { %508 = vrot.lane.b32.xlu1 %v1699_v59, %s1812_s1 }
 0x3ed   :  { %v509_v60 = vpop.permute.xlu1 %508 }
 0x3ee   :  { %v2014_v61 = vmul.f32 %v1697_v49, %v509_v60 }
 0x3f0   :  { %v519_v62 = vpack.c.bf16 %v2014_v61, %v2014_v61 }
 0x3f2   :  { %525 = vrot.lane.b32.xlu0 %v519_v62, %s1813_s23 }
 0x464   :  { %v526_v63 = vpop.permute.xlu0 %525 }
 0x465   :  { %1592 = vmatmul.mubr.msk.bf16.vlgmr.msra.gmra.mxu0 %vm334_vm2, %v526_v63 }
 0x466   :  { %1599 = vmatprep.mubr.msk.bf16.mxu0 %vm1811_vm1, %v1810_v52  ;;  %1596 = vmatpush3.bf16.msra.mxu0 %v1678_v15 }
 0x467   :  { %1597 = vmatprep.subr.bf16.mxu0 %v1810_v52 }
 0x46a   :  { %1598 = vmatpush3.bf16.msra.mxu0 %v1679_v16 }
 0x46b   :  { %1603 = vmatprep.subr.bf16.mxu0 %v1810_v52 }
 0x525   :  { %v576_v0 = vpop.f32.mrf.mxu0 }
 0x526   :  { %v582_v1 = vadd.f32 %v576_v0, %v385_v29 }
 0x527   :  { %v1593_v2 = vpop.f32.mrf.mxu0 }
 0x528   :  { %1700 = vtanh.f32 %v582_v1  ;;  %v1448_v6 = vmul.f32 -1.442695, %v582_v1  ;;  %v1682_v1 = vld [vmem:[%s2194_s9 + $0x8] sm:$0xff]   ;;  %v1683_v2 = vld [vmem:[%s2194_s9] sm:$0xff]  }
 0x529   :  { %v579_v3 = vpop.f32.mrf.mxu0  ;;  %1612 = vmatpush3.bf16.msra.mxu1 %v1682_v1 }
 0x52a   :  { %1702 = vpow2.f32 %v1448_v6  ;;  %1613 = vmatprep.subr.bf16.mxu1 %v1810_v52 }
 0x52b   :  { %v1594_v4 = vpop.f32.mrf.mxu0 }
 0x52d   :  { %1614 = vmatpush3.bf16.msra.mxu1 %v1683_v2 }
 0x52e   :  { %1627 = vmatprep.subr.bf16.mxu1 %v1810_v52 }
 0x535   :  { %v1701_v5 = vpop.eup %1700 }
 0x536   :  { %592 = vrot.lane.b32.xlu1 %v1701_v5, %s1812_s1 }
 0x537   :  { %v1703_v7 = vpop.eup %1702 }
 0x538   :  { %v586_v8 = vadd.f32 1.0, %v1703_v7 }
 0x53a   :  { %1704 = vrcp.f32 %v586_v8 }
 0x547   :  { %v1705_v9 = vpop.eup %1704 }
 0x548   :  { %v590_v12 = vmul.f32 %v1705_v9, %v505_v56 }
 0x5a8   :  { %v593_v10 = vpop.permute.xlu1 %592 }
 0x5a9   :  { %v595_v11 = vmul.f32 %v1705_v9, %v593_v10 }
 0x5ab   :  { %597 = vrot.lane.b32.xlu0 %v595_v11, %s1813_s23 }
 0x61d   :  { %v598_v13 = vpop.permute.xlu0 %597 }
 0x61e   :  { %v600_v14 = vadd.f32 %v598_v13, %v590_v12 }
 0x620   :  { %1706 = vtanh.f32 %v600_v14 }
 0x62d   :  { %v1707_v17 = vpop.eup %1706 }
 0x62e   :  { %603 = vrot.lane.b32.xlu1 %v1707_v17, %s1812_s1 }
 0x6a0   :  { %v604_v18 = vpop.permute.xlu1 %603 }
 0x6a1   :  { %v2033_v19 = vmul.f32 %v1705_v9, %v604_v18 }
 0x6a3   :  { %v615_v20 = vpack.c.bf16 %v2033_v19, %v2033_v19 }
 0x6a5   :  { %621 = vrot.lane.b32.xlu0 %v615_v20, %s1813_s23 }
 0x717   :  { %v622_v21 = vpop.permute.xlu0 %621 }
 0x718   :  { %1600 = vmatmul.mubr.msk.bf16.vlgmr.msra.gmra.mxu0 %vm334_vm2, %v622_v21 }
 0x719   :  { %1607 = vmatprep.mubr.msk.bf16.mxu0 %vm1811_vm1, %v1810_v52  ;;  %1604 = vmatpush3.bf16.msra.mxu0 %v1680_v42 }
 0x71a   :  { %1605 = vmatprep.subr.bf16.mxu0 %v1810_v52 }
 0x71d   :  { %1606 = vmatpush3.bf16.msra.mxu0 %v1681_v43 }
 0x71e   :  { %1619 = vmatprep.subr.bf16.mxu0 %v1810_v52 }
 0x7d8   :  { %v672_v22 = vpop.f32.mrf.mxu0 }
 0x7d9   :  { %v678_v23 = vadd.f32 %v672_v22, %v1987_v24 }
 0x7da   :  { %v1601_v25 = vpop.f32.mrf.mxu0 }
 0x7db   :  { %1708 = vtanh.f32 %v678_v23  ;;  %v1452_v30 = vmul.f32 -1.442695, %v678_v23  ;;  %v1684_v23 = vld [vmem:[%s2194_s9 + $0x8] sm:$0xff]   ;;  %v1685_v25 = vld [vmem:[%s2194_s9] sm:$0xff]  }
 0x7dc   :  { %v675_v26 = vpop.f32.mrf.mxu0 }
 0x7dd   :  { %1710 = vpow2.f32 %v1452_v30 }
 0x7de   :  { %v1602_v28 = vpop.f32.mrf.mxu0 }
 0x7e8   :  { %v1709_v29 = vpop.eup %1708 }
 0x7e9   :  { %688 = vrot.lane.b32.xlu1 %v1709_v29, %s1812_s1 }
 0x7ea   :  { %v1711_v32 = vpop.eup %1710 }
 0x7eb   :  { %v682_v34 = vadd.f32 1.0, %v1711_v32 }
 0x7ed   :  { %1712 = vrcp.f32 %v682_v34 }
 0x7fa   :  { %v1713_v36 = vpop.eup %1712 }
 0x7fb   :  { %v686_v40 = vmul.f32 %v1713_v36, %v600_v14 }
 0x85b   :  { %v689_v37 = vpop.permute.xlu1 %688 }
 0x85c   :  { %v691_v39 = vmul.f32 %v1713_v36, %v689_v37 }
 0x85e   :  { %693 = vrot.lane.b32.xlu0 %v691_v39, %s1813_s23 }
 0x8d0   :  { %v694_v41 = vpop.permute.xlu0 %693 }
 0x8d1   :  { %v696_v24 = vadd.f32 %v694_v41, %v686_v40 }
 0x8d3   :  { %1714 = vtanh.f32 %v696_v24 }
 0x8e0   :  { %v1715_v44 = vpop.eup %1714 }
 0x8e1   :  { %699 = vrot.lane.b32.xlu1 %v1715_v44, %s1812_s1 }
 0x953   :  { %v700_v45 = vpop.permute.xlu1 %699 }
 0x954   :  { %v2053_v46 = vmul.f32 %v1713_v36, %v700_v45 }
 0x956   :  { %v711_v47 = vpack.c.bf16 %v2053_v46, %v2053_v46 }
 0x958   :  { %717 = vrot.lane.b32.xlu0 %v711_v47, %s1813_s23 }
 0x9ca   :  { %v718_v48 = vpop.permute.xlu0 %717 }
 0x9cb   :  { %1608 = vmatmul.mubr.msk.bf16.vlgmr.msra.gmra.mxu0 %vm334_vm2, %v718_v48 }
 0x9cc   :  { %1623 = vmatprep.mubr.msk.bf16.mxu0 %vm1811_vm1, %v1810_v52  ;;  %1620 = vmatpush3.bf16.msra.mxu0 %v1684_v23 }
 0x9cd   :  { %1621 = vmatprep.subr.bf16.mxu0 %v1810_v52 }
 0x9d0   :  { %1622 = vmatpush3.bf16.msra.mxu0 %v1685_v25 }
 0x9d1   :  { %1635 = vmatprep.subr.bf16.mxu0 %v1810_v52 }
 0xa8b   :  { %v768_v49 = vpop.f32.mrf.mxu0 }
 0xa8c   :  { %v774_v50 = vadd.f32 %v768_v49, %v1989_v27 }
 0xa8d   :  { %v1609_v51 = vpop.f32.mrf.mxu0 }
 0xa8e   :  { %1716 = vtanh.f32 %v774_v50  ;;  %v1456_v56 = vmul.f32 -1.442695, %v774_v50  ;;  %v1686_v50 = vld [vmem:[%s2194_s9 + $0x8] sm:$0xff]   ;;  %v1687_v51 = vld [vmem:[%s2194_s9] sm:$0xff]  }
 0xa8f   :  { %v771_v53 = vpop.f32.mrf.mxu0 }
 0xa90   :  { %1718 = vpow2.f32 %v1456_v56 }
 0xa91   :  { %v1610_v54 = vpop.f32.mrf.mxu0 }
 0xa9b   :  { %v1717_v55 = vpop.eup %1716 }
 0xa9c   :  { %784 = vrot.lane.b32.xlu1 %v1717_v55, %s1812_s1 }
 0xa9d   :  { %v1719_v57 = vpop.eup %1718 }
 0xa9e   :  { %v778_v58 = vadd.f32 1.0, %v1719_v57 }
 0xaa0   :  { %1720 = vrcp.f32 %v778_v58 }
 0xaad   :  { %v1721_v59 = vpop.eup %1720 }
 0xaae   :  { %v782_v63 = vmul.f32 %v1721_v59, %v696_v24 }
 0xb0e   :  { %v785_v60 = vpop.permute.xlu1 %784 }
 0xb0f   :  { %v787_v62 = vmul.f32 %v1721_v59, %v785_v60 }
 0xb11   :  { %789 = vrot.lane.b32.xlu0 %v787_v62, %s1813_s23 }
 0xb83   :  { %v790_v0 = vpop.permute.xlu0 %789 }
 0xb84   :  { %v792_v27 = vadd.f32 %v790_v0, %v782_v63 }
 0xb86   :  { %1722 = vtanh.f32 %v792_v27 }
 0xb93   :  { %v1723_v3 = vpop.eup %1722 }
 0xb94   :  { %795 = vrot.lane.b32.xlu1 %v1723_v3, %s1812_s1 }
 0xc06   :  { %v796_v4 = vpop.permute.xlu1 %795 }
 0xc07   :  { %v2073_v5 = vmul.f32 %v1721_v59, %v796_v4 }
 0xc09   :  { %v807_v6 = vpack.c.bf16 %v2073_v5, %v2073_v5 }
 0xc0b   :  { %813 = vrot.lane.b32.xlu0 %v807_v6, %s1813_s23 }
 0xc7d   :  { %v814_v7 = vpop.permute.xlu0 %813 }
 0xc7e   :  { %1616 = vmatmul.mubr.msk.bf16.vlgmr.msra.gmra.mxu1 %vm334_vm2, %v814_v7 }
 0xc7f   :  { %1631 = vmatprep.mubr.msk.bf16.mxu1 %vm1811_vm1, %v1810_v52  ;;  %1628 = vmatpush3.bf16.msra.mxu1 %v1686_v50 }
 0xc80   :  { %1629 = vmatprep.subr.bf16.mxu1 %v1810_v52 }
 0xc83   :  { %1630 = vmatpush3.bf16.msra.mxu1 %v1687_v51 }
 0xd3e   :  { %v864_v8 = vpop.f32.mrf.mxu1 }
 0xd3f   :  { %v870_v9 = vadd.f32 %v864_v8, %v1993_v33 }
 0xd40   :  { %v1617_v10 = vpop.f32.mrf.mxu1 }
 0xd41   :  { %1724 = vtanh.f32 %v870_v9  ;;  %v1460_v14 = vmul.f32 -1.442695, %v870_v9  ;;  %v1688_v9 = vld [vmem:[%s2194_s9 + $0x8] sm:$0xff]   ;;  %v1689_v10 = vld [vmem:[%s2194_s9] sm:$0xff]  }
 0xd42   :  { %v867_v11 = vpop.f32.mrf.mxu1 }
 0xd43   :  { %1726 = vpow2.f32 %v1460_v14 }
 0xd44   :  { %v1618_v12 = vpop.f32.mrf.mxu1 }
 0xd4e   :  { %v1725_v13 = vpop.eup %1724 }
 0xd4f   :  { %880 = vrot.lane.b32.xlu1 %v1725_v13, %s1812_s1 }
 0xd50   :  { %v1727_v15 = vpop.eup %1726 }
 0xd51   :  { %v874_v16 = vadd.f32 1.0, %v1727_v15 }
 0xd53   :  { %1728 = vrcp.f32 %v874_v16 }
 0xd60   :  { %v1729_v17 = vpop.eup %1728 }
 0xd61   :  { %v878_v21 = vmul.f32 %v1729_v17, %v792_v27 }
 0xdc1   :  { %v881_v18 = vpop.permute.xlu1 %880 }
 0xdc2   :  { %v883_v20 = vmul.f32 %v1729_v17, %v881_v18 }
 0xdc4   :  { %885 = vrot.lane.b32.xlu0 %v883_v20, %s1813_s23 }
 0xe36   :  { %v886_v22 = vpop.permute.xlu0 %885 }
 0xe37   :  { %v888_v33 = vadd.f32 %v886_v22, %v878_v21 }
 0xe39   :  { %1730 = vtanh.f32 %v888_v33 }
 0xe46   :  { %v1731_v26 = vpop.eup %1730 }
 0xe47   :  { %891 = vrot.lane.b32.xlu1 %v1731_v26, %s1812_s1 }
 0xeb9   :  { %v892_v28 = vpop.permute.xlu1 %891 }
 0xeba   :  { %v2093_v29 = vmul.f32 %v1729_v17, %v892_v28 }
 0xebc   :  { %v903_v30 = vpack.c.bf16 %v2093_v29, %v2093_v29 }
 0xebe   :  { %909 = vrot.lane.b32.xlu0 %v903_v30, %s1813_s23 }
 0xf30   :  { %v910_v32 = vpop.permute.xlu0 %909 }
 0xf31   :  { %1624 = vmatmul.mubr.msk.bf16.vlgmr.msra.gmra.mxu0 %vm334_vm2, %v910_v32 }
 0xf32   :  { %1639 = vmatprep.mubr.msk.bf16.mxu0 %vm1811_vm1, %v1810_v52  ;;  %1636 = vmatpush3.bf16.msra.mxu0 %v1688_v9 }
 0xf33   :  { %1637 = vmatprep.subr.bf16.mxu0 %v1810_v52 }
 0xf36   :  { %1638 = vmatpush3.bf16.msra.mxu0 %v1689_v10 }
 0xff1   :  { %v960_v34 = vpop.f32.mrf.mxu0 }
 0xff2   :  { %v966_v36 = vadd.f32 %v960_v34, %v1997_v38 }
 0xff3   :  { %v1625_v37 = vpop.f32.mrf.mxu0 }
 0xff4   :  { %1732 = vtanh.f32 %v966_v36  ;;  %v1464_v24 = vmul.f32 -1.442695, %v966_v36 }
 0xff5   :  { %v963_v39 = vpop.f32.mrf.mxu0 }
 0xff6   :  { %1734 = vpow2.f32 %v1464_v24  ;;  %v1691_v39 = vld [vmem:[%s2195_s10] sm:$0xff]  }
 0xff7   :  { %v1626_v40 = vpop.f32.mrf.mxu0 }
0x1001   :  { %v1733_v41 = vpop.eup %1732 }
0x1002   :  { %976 = vrot.lane.b32.xlu1 %v1733_v41, %s1812_s1 }
0x1003   :  { %v1735_v42 = vpop.eup %1734 }
0x1004   :  { %v970_v43 = vadd.f32 1.0, %v1735_v42 }
0x1006   :  { %1736 = vrcp.f32 %v970_v43 }
0x1013   :  { %v1737_v44 = vpop.eup %1736 }
0x1014   :  { %v974_v48 = vmul.f32 %v1737_v44, %v888_v33 }
0x1074   :  { %v977_v45 = vpop.permute.xlu1 %976 }
0x1075   :  { %v979_v47 = vmul.f32 %v1737_v44, %v977_v45 }
0x1077   :  { %981 = vrot.lane.b32.xlu0 %v979_v47, %s1813_s23 }
0x10e9   :  { %v982_v49 = vpop.permute.xlu0 %981 }
0x10ea   :  { %v984_v38 = vadd.f32 %v982_v49, %v974_v48 }
0x10ec   :  { %1738 = vtanh.f32 %v984_v38 }
0x10f9   :  { %v1739_v53 = vpop.eup %1738 }
0x10fa   :  { %987 = vrot.lane.b32.xlu1 %v1739_v53, %s1812_s1 }
0x116c   :  { %v988_v54 = vpop.permute.xlu1 %987 }
0x116d   :  { %v2112_v55 = vmul.f32 %v1737_v44, %v988_v54 }
0x116f   :  { %v999_v56 = vpack.c.bf16 %v2112_v55, %v2112_v55 }
0x1171   :  { %1005 = vrot.lane.b32.xlu0 %v999_v56, %s1813_s23 }
0x11e3   :  { %v1006_v57 = vpop.permute.xlu0 %1005 }
0x11e4   :  { %1632 = vmatmul.mubr.msk.bf16.vlgmr.msra.gmra.mxu1 %vm334_vm2, %v1006_v57  ;;  %v1473_v57 = vld [vmem:[%s2196_s11] ss:$0 sm:$0xff]  ;;  %s1814_s11 = smov 96  }
0x12a4   :  { %v1056_v58 = vpop.f32.mrf.mxu1 }
0x12a5   :  { %v1062_v59 = vadd.f32 %v1056_v58, %v1991_v31 }
0x12a6   :  { %v1633_v60 = vpop.f32.mrf.mxu1 }
0x12a7   :  { %1740 = vtanh.f32 %v1062_v59  ;;  %v1468_v27 = vmul.f32 -1.442695, %v1062_v59 }
0x12a8   :  { %v1059_v62 = vpop.f32.mrf.mxu1 }
0x12a9   :  { %1742 = vpow2.f32 %v1468_v27 }
0x12aa   :  { %v1634_v63 = vpop.f32.mrf.mxu1 }
0x12b4   :  { %v1741_v0 = vpop.eup %1740 }
0x12b5   :  { %1072 = vrot.lane.b32.xlu1 %v1741_v0, %s1812_s1 }
0x12b6   :  { %v1743_v1 = vpop.eup %1742 }
0x12b7   :  { %v1066_v2 = vadd.f32 1.0, %v1743_v1 }
0x12b9   :  { %1744 = vrcp.f32 %v1066_v2 }
0x12c6   :  { %v1745_v3 = vpop.eup %1744 }
0x12c7   :  { %v1070_v7 = vmul.f32 %v1745_v3, %v984_v38 }
0x1327   :  { %v1073_v4 = vpop.permute.xlu1 %1072 }
0x1328   :  { %v1075_v6 = vmul.f32 %v1745_v3, %v1073_v4 }
0x132a   :  { %1077 = vrot.lane.b32.xlu0 %v1075_v6, %s1813_s23 }
0x139c   :  { %v1078_v8 = vpop.permute.xlu0 %1077 }
0x139d   :  { %v1080_v31 = vadd.f32 %v1078_v8, %v1070_v7 }
0x139f   :  { %1746 = vtanh.f32 %v1080_v31 }
0x13ac   :  { %v1747_v11 = vpop.eup %1746 }
0x13ad   :  { %1083 = vrot.lane.b32.xlu1 %v1747_v11, %s1812_s1 }
0x141f   :  { %v1084_v12 = vpop.permute.xlu1 %1083 }
0x1420   :  { %v1086_v13 = vmul.f32 %v1745_v3, %v1084_v12 }
0x1422   :  { %v1095_v14 = vpack.c.bf16 %v1086_v13, %v1086_v13 }
0x1424   :  { %1101 = vrot.lane.b32.xlu0 %v1095_v14, %s1813_s23 }
0x1496   :  { %v1102_v15 = vpop.permute.xlu0 %1101 }
0x1497   :  { %1640 = vmatmul.mubr.msk.bf16.vlgmr.msra.gmra.mxu0 %vm334_vm2, %v1102_v15 }
0x1557   :  { %v1152_v16 = vpop.f32.mrf.mxu0 }
0x1558   :  { %v1158_v17 = vadd.f32 %v1152_v16, %v1995_v35 }
0x1559   :  { %v1641_v18 = vpop.f32.mrf.mxu0 }
0x155a   :  { %1748 = vtanh.f32 %v1158_v17  ;;  %v1472_v22 = vmul.f32 -1.442695, %v1158_v17 }
0x155b   :  { %v1155_v20 = vpop.f32.mrf.mxu0 }
0x155c   :  { %1750 = vpow2.f32 %v1472_v22 }
0x155d   :  { %v1642_v21 = vpop.f32.mrf.mxu0 }
0x1567   :  { %v1749_v52 = vpop.eup %1748 }
0x1568   :  { %1168 = vrot.lane.b32.xlu1 %v1749_v52, %s1812_s1 }
0x1569   :  { %v1751_v33 = vpop.eup %1750 }
0x156a   :  { %v1162_v23 = vadd.f32 1.0, %v1751_v33 }
0x156c   :  { %1752 = vrcp.f32 %v1162_v23 }
0x1579   :  { %v1753_v25 = vpop.eup %1752 }
0x157a   :  { %v1166_v35 = vmul.f32 %v1753_v25, %v1080_v31 }
0x15da   :  { %v1169_v26 = vpop.permute.xlu1 %1168 }
0x15db   :  { %v1171_v28 = vmul.f32 %v1753_v25, %v1169_v26 }
0x15dd   :  { %1173 = vrot.lane.b32.xlu0 %v1171_v28, %s1813_s23 }
0x15e1   :  { %513 = vrot.lane.b32.xlu0 %v2014_v61, %s1813_s23 }
0x15e5   :  { %704 = vrot.lane.b32.xlu0 %v2053_v46, %s1813_s23  ;;  %v1690_v46 = vld [vmem:[%s2195_s10 + $0x8] sm:$0xff]  }
0x15e6   :  { %1643 = vmatprep.subr.bf16.mxu1 %v1690_v46 }
0x15e7   :  { %1644 = vmatpush3.bf16.msra.mxu1 %v1690_v46 }
0x15e8   :  { %1645 = vmatprep.subr.bf16.mxu1 %v1691_v39 }
0x15e9   :  { %896 = vrot.lane.b32.xlu0 %v2093_v29, %s1813_s23 }
0x15eb   :  { %1646 = vmatpush3.bf16.msra.mxu1 %v1691_v39 }
0x15ed   :  { %1088 = vrot.lane.b32.xlu0 %v1086_v13, %s1813_s23 }
0x164f   :  { %v1174_v30 = vpop.permute.xlu0 %1173 }
0x1650   :  { %v2141_v32 = vadd.f32 %v1174_v30, %v1166_v35 }
0x1652   :  { %1754 = vtanh.f32 %v2141_v32 }
0x1653   :  { %v514_v34 = vpop.permute.xlu0 %513 }
0x1654   :  { %516 = vst.msk [vmem:[#allocation3] sm:$0xff] %vm334_vm2, %v514_v34 }
0x1657   :  { %v705_v36 = vpop.permute.xlu0 %704 }
0x1658   :  { %708 = vst.msk [vmem:[#allocation3 + $0x10] sm:$0xff] %vm334_vm2, %v705_v36 }
0x165b   :  { %v897_v61 = vpop.permute.xlu0 %896  ;;  %v1195_v44 = vld [vmem:[#allocation3] sm:$0xff] }
0x165c   :  { %900 = vst.msk [vmem:[#allocation3 + $0x20] sm:$0xff] %vm334_vm2, %v897_v61 }
0x165f   :  { %v1755_v29 = vpop.eup %1754  ;;  %v1089_v37 = vpop.permute.xlu0 %1088 }
0x1660   :  { %1092 = vst.msk [vmem:[#allocation3 + $0x30] sm:$0xff] %vm334_vm2, %v1089_v37  ;;  %1179 = vrot.lane.b32.xlu1 %v1755_v29, %s1812_s1 }
0x1663   :  { %v1199_v49 = vld [vmem:[#allocation3 + $0x20] sm:$0xff] }
0x1664   :  { %608 = vrot.lane.b32.xlu1 %v2033_v19, %s1813_s23 }
0x1667   :  { %v1201_v53 = vld [vmem:[#allocation3 + $0x30] sm:$0xff] }
0x1668   :  { %800 = vrot.lane.b32.xlu1 %v2073_v5, %s1813_s23  ;;  %v1197_v5 = vld [vmem:[#allocation3 + $0x10] sm:$0xff] }
0x166c   :  { %992 = vrot.lane.b32.xlu1 %v2112_v55, %s1813_s23 }
0x16d2   :  { %v1180_v40 = vpop.permute.xlu1 %1179 }
0x16d3   :  { %v1182_v41 = vmul.f32 %v1753_v25, %v1180_v40 }
0x16d5   :  { %1184 = vrot.lane.b32.xlu1 %v1182_v41, %s1813_s23 }
0x16d6   :  { %v609_v24 = vpop.permute.xlu1 %608 }
0x16d7   :  { %612 = vst.msk [vmem:[#allocation3 + $0x8] sm:$0xff] %vm334_vm2, %v609_v24 }
0x16da   :  { %v801_v42 = vpop.permute.xlu1 %800 }
0x16db   :  { %804 = vst.msk [vmem:[#allocation3 + $0x18] sm:$0xff] %vm334_vm2, %v801_v42 }
0x16de   :  { %v993_v43 = vpop.permute.xlu1 %992  ;;  %v1196_v45 = vld [vmem:[#allocation3 + $0x8] sm:$0xff] }
0x16df   :  { %996 = vst.msk [vmem:[#allocation3 + $0x28] sm:$0xff] %vm334_vm2, %v993_v43  ;;  %v1203_v19 = vpack.c.bf16 %v1196_v45, %v1195_v44 }
0x16e1   :  { %1647 = vmatprep.mubr.msk.bf16.mxu1 %vm334_vm2, %v1203_v19 }
0x16e2   :  { %v1198_v47 = vld [vmem:[#allocation3 + $0x18] sm:$0xff] }
0x16e3   :  { %v1204_v48 = vpack.c.bf16 %v1198_v47, %v1197_v5 }
0x16e5   :  { %1648 = vmatmul.mubr.msk.bf16.vlgmr.msra.gmra.mxu1 %vm334_vm2, %v1204_v48 }
0x16e6   :  { %v1200_v38 = vld [vmem:[#allocation3 + $0x28] sm:$0xff] }
0x16e7   :  { %v1205_v50 = vpack.c.bf16 %v1200_v38, %v1199_v49 }
0x16e9   :  { %1651 = vmatprep.mubr.msk.bf16.mxu1 %vm334_vm2, %v1205_v50 }
0x1747   :  { %v1185_v51 = vpop.permute.xlu1 %1184 }
0x1748   :  { %1188 = vst.msk [vmem:[#allocation3 + $0x38] sm:$0xff] %vm334_vm2, %v1185_v51  ;;  %1189 = vst.msk [vmem:[%s2198_s13] sm:$0xff] %vm334_vm2, %v1185_v51 }
0x174f   :  { %v1202_v54 = vld [vmem:[#allocation3 + $0x38] sm:$0xff] }
0x1750   :  { %v1206_v55 = vpack.c.bf16 %v1202_v54, %v1201_v53 }
0x1752   :  { %1652 = vmatmul.mubr.msk.bf16.gmra.mxu1 %vm334_vm2, %v1206_v55 }
0x17a5   :  { %v1649_v56 = vpop.f32.mrf.mxu1 }
0x17a6   :  { %v1285_v63 = vadd.f32 %v1649_v56, %v1473_v57 }
0x17a7   :  { %v1276_v58 = vpop.f32.mrf.mxu1 }
0x17a8   :  { %v1277_v59 = vadd.f32 %v1473_v57, %v1276_v58 }
0x17a9   :  { %v1650_v60 = vpop.f32.mrf.mxu1 }
0x17aa   :  { %1307 = vmax.xlane.f32.xlu0 %v1277_v59  ;;  %v1288_v27 = vadd.f32 %v1650_v60, %v1473_v57 }
0x17ab   :  { %v1279_v62 = vpop.f32.mrf.mxu1 }
0x17ac   :  { %v1280_v0 = vadd.f32 %v1473_v57, %v1279_v62 }
0x17ae   :  { %1309 = vmax.xlane.f32.xlu1 %v1280_v0  ;;  %1311 = vmax.xlane.f32.xlu0 %v1285_v63 }
0x17b2   :  { %1313 = vmax.xlane.f32.xlu0 %v1288_v27 }
0x1812   :  { %v1653_v1 = vpop.f32.mrf.mxu1 }
0x1813   :  { %v1301_v7 = vadd.f32 %v1653_v1, %v1473_v57 }
0x1814   :  { %v1292_v2 = vpop.f32.mrf.mxu1 }
0x1815   :  { %v1293_v3 = vadd.f32 %v1473_v57, %v1292_v2 }
0x1816   :  { %v1654_v4 = vpop.f32.mrf.mxu1 }
0x1817   :  { %1315 = vmax.xlane.f32.xlu1 %v1293_v3  ;;  %v1304_v31 = vadd.f32 %v1654_v4, %v1473_v57 }
0x1818   :  { %v1295_v6 = vpop.f32.mrf.mxu1 }
0x1819   :  { %v1296_v8 = vadd.f32 %v1473_v57, %v1295_v6 }
0x181b   :  { %1317 = vmax.xlane.f32.xlu0 %v1296_v8  ;;  %1319 = vmax.xlane.f32.xlu1 %v1301_v7 }
0x181f   :  { %1321 = vmax.xlane.f32.xlu0 %v1304_v31 }
0x1833   :  { %v1308_v9 = vpop.xlane.xlu0 %1307 }
0x1834   :  { %v1323_v10 = vsub.f32 %v1277_v59, %v1308_v9 }
0x1836   :  { %v1331_v11 = vmul.f32 1.442695, %v1323_v10 }
0x1837   :  { %v1312_v12 = vpop.xlane.xlu0 %1311  ;;  %v1310_v13 = vpop.xlane.xlu1 %1309 }
0x1838   :  { %1756 = vpow2.f32 %v1331_v11  ;;  %v1325_v14 = vsub.f32 %v1285_v63, %v1312_v12  ;;  %v1324_v15 = vsub.f32 %v1280_v0, %v1310_v13 }
0x183a   :  { %v1335_v16 = vmul.f32 1.442695, %v1325_v14  ;;  %v1333_v17 = vmul.f32 1.442695, %v1324_v15 }
0x183b   :  { %v1314_v18 = vpop.xlane.xlu0 %1313 }
0x183c   :  { %1758 = vpow2.f32 %v1335_v16  ;;  %v1326_v20 = vsub.f32 %v1288_v27, %v1314_v18 }
0x183d   :  { %1760 = vpow2.f32 %v1333_v17 }
0x183e   :  { %v1337_v21 = vmul.f32 1.442695, %v1326_v20 }
0x1840   :  { %1762 = vpow2.f32 %v1337_v21 }
0x1845   :  { %v1757_v52 = vpop.eup %1756 }
0x1846   :  { %1347 = vadd.xlane.f32.xlu1 %v1757_v52 }
0x1849   :  { %v1759_v22 = vpop.eup %1758 }
0x184a   :  { %v1761_v33 = vpop.eup %1760  ;;  %1351 = vadd.xlane.f32.xlu1 %v1759_v22 }
0x184b   :  { %1349 = vadd.xlane.f32.xlu0 %v1761_v33 }
0x184d   :  { %v1763_v23 = vpop.eup %1762 }
0x184f   :  { %1353 = vadd.xlane.f32.xlu0 %v1763_v23 }
0x18a0   :  { %v1316_v25 = vpop.xlane.xlu1 %1315 }
0x18a1   :  { %v1327_v34 = vsub.f32 %v1293_v3, %v1316_v25 }
0x18a3   :  { %v1339_v37 = vmul.f32 1.442695, %v1327_v34 }
0x18a4   :  { %v1318_v26 = vpop.xlane.xlu0 %1317  ;;  %v1320_v28 = vpop.xlane.xlu1 %1319 }
0x18a5   :  { %v1328_v35 = vsub.f32 %v1296_v8, %v1318_v26  ;;  %v1329_v30 = vsub.f32 %v1301_v7, %v1320_v28 }
0x18a7   :  { %v1341_v36 = vmul.f32 1.442695, %v1328_v35  ;;  %v1343_v61 = vmul.f32 1.442695, %v1329_v30 }
0x18a8   :  { %v1322_v46 = vpop.xlane.xlu0 %1321 }
0x18a9   :  { %1764 = vpow2.f32 %v1341_v36  ;;  %v1330_v29 = vsub.f32 %v1304_v31, %v1322_v46 }
0x18aa   :  { %1766 = vpow2.f32 %v1343_v61 }
0x18ab   :  { %v1345_v39 = vmul.f32 1.442695, %v1330_v29 }
0x18ad   :  { %1768 = vpow2.f32 %v1345_v39 }
0x18ae   :  { %1770 = vpow2.f32 %v1339_v37 }
0x18b6   :  { %v1765_v40 = vpop.eup %1764 }
0x18b7   :  { %v1767_v41 = vpop.eup %1766  ;;  %1357 = vadd.xlane.f32.xlu0 %v1765_v40 }
0x18b8   :  { %1359 = vadd.xlane.f32.xlu1 %v1767_v41 }
0x18ba   :  { %v1769_v24 = vpop.eup %1768 }
0x18bb   :  { %v1771_v42 = vpop.eup %1770  ;;  %1361 = vadd.xlane.f32.xlu0 %v1769_v24 }
0x18bc   :  { %1355 = vadd.xlane.f32.xlu1 %v1771_v42 }
0x18cd   :  { %1191 = vrot.lane.b32.xlu1 %v2141_v32, %s1814_s11 }
0x18cf   :  { %v1348_v43 = vpop.xlane.xlu1 %1347 }
0x18d0   :  { %1772 = vrcp.f32 %v1348_v43 }
0x18d3   :  { %v1352_v44 = vpop.xlane.xlu1 %1351 }
0x18d4   :  { %v1350_v45 = vpop.xlane.xlu0 %1349  ;;  %1774 = vrcp.f32 %v1352_v44 }
0x18d5   :  { %1776 = vrcp.f32 %v1350_v45 }
0x18d8   :  { %v1354_v19 = vpop.xlane.xlu0 %1353 }
0x18d9   :  { %1778 = vrcp.f32 %v1354_v19 }
0x18dd   :  { %v1773_v5 = vpop.eup %1772 }
0x18de   :  { %v1371_v47 = vmul.f32 %v1773_v5, %v1757_v52 }
0x18e0   :  { %v1379_v48 = vmin.f32 %v1371_v47, 1.0 }
0x18e1   :  { %v1775_v49 = vpop.eup %1774 }
0x18e2   :  { %v1777_v38 = vpop.eup %1776  ;;  %1387 = vst [vmem:[#allocation4] sm:$0xff] %v1379_v48  ;;  %v1373_v50 = vmul.f32 %v1775_v49, %v1759_v22 }
0x18e3   :  { %v1372_v51 = vmul.f32 %v1777_v38, %v1761_v33 }
0x18e4   :  { %v1381_v53 = vmin.f32 %v1373_v50, 1.0 }
0x18e5   :  { %v1380_v54 = vmin.f32 %v1372_v51, 1.0 }
0x18e6   :  { %v1779_v55 = vpop.eup %1778  ;;  %1389 = vst [vmem:[#allocation4 + $0x10] sm:$0xff] %v1381_v53 }
0x18e7   :  { %1388 = vst [vmem:[#allocation4 + $0x8] sm:$0xff] %v1380_v54  ;;  %v1374_v32 = vmul.f32 %v1779_v55, %v1763_v23 }
0x18e9   :  { %v1382_v56 = vmin.f32 %v1374_v32, 1.0 }
0x18eb   :  { %1390 = vst [vmem:[#allocation4 + $0x18] sm:$0xff] %v1382_v56 }
0x1940   :  { %v1358_v57 = vpop.xlane.xlu0 %1357 }
0x1941   :  { %1780 = vrcp.f32 %v1358_v57  ;;  %v1360_v58 = vpop.xlane.xlu1 %1359 }
0x1942   :  { %1782 = vrcp.f32 %v1360_v58 }
0x1944   :  { %v1362_v59 = vpop.xlane.xlu0 %1361 }
0x1945   :  { %1784 = vrcp.f32 %v1362_v59  ;;  %v1356_v60 = vpop.xlane.xlu1 %1355 }
0x1946   :  { %1786 = vrcp.f32 %v1356_v60 }
0x1949   :  { %v1192_v62 = vpop.permute.xlu1 %1191 }
0x194a   :  { %1194 = vst.msk [vmem:[%s2199_s14] sm:$0xff] %vm334_vm2, %v1192_v62  ;;  %s1788_s14 = scalar_lea.vmem %s1401_s16, 1024 }
0x194b   :  { %p1789_p0 = scmp.ne.s32.totalorder %s1401_s16, %s1788_s14  ;;  %p1794_p2 = scmp.lt.s32.totalorder %s1788_s14, %s1788_s14 }
0x194d   :  { %p1795_p3 = por %p1794_p2, %p1793_p1 }
0x194e   :  { %v1781_v63 = vpop.eup %1780 }
0x194f   :  { %v1783_v0 = vpop.eup %1782  ;;  %v1376_v27 = vmul.f32 %v1781_v63, %v1765_v40  ;;  %p1796_p4 = pnand %p1795_p3, %p1789_p0 }
0x1950   :  { %v1377_v1 = vmul.f32 %v1783_v0, %v1767_v41 }
0x1951   :  { %v1384_v2 = vmin.f32 %v1376_v27, 1.0 }
0x1952   :  { %v1785_v3 = vpop.eup %1784  ;;  %v1385_v4 = vmin.f32 %v1377_v1, 1.0 }
0x1953   :  { %v1787_v6 = vpop.eup %1786  ;;  %1392 = vst [vmem:[#allocation4 + $0x28] sm:$0xff] %v1384_v2  ;;  %v1378_v7 = vmul.f32 %v1785_v3, %v1769_v24 }
0x1954   :  { %1393 = vst [vmem:[#allocation4 + $0x30] sm:$0xff] %v1385_v4  ;;  %v1375_v8 = vmul.f32 %v1787_v6, %v1771_v42 }
0x1955   :  { %v1386_v31 = vmin.f32 %v1378_v7, 1.0 }
0x1956   :  { %v1383_v9 = vmin.f32 %v1375_v8, 1.0 }
0x1957   :  { %1394 = vst [vmem:[#allocation4 + $0x38] sm:$0xff] %v1386_v31 }
0x1958   :  { %1391 = vst [vmem:[#allocation4 + $0x20] sm:$0xff] %v1383_v9 }
0x1959   :  { %1799 = shalt.err (!%p1796_p4)
}
0x195a   :  { %s1816_s17 = smov 128   ;;  %s1817_s7 = smov 8  }
0x195b   :  { %1406 = dma.vmem_to_hbm [thread:$0]  %s1401_s16, 1024, %s2197_s12, [#allocation5], %s1816_s17, %s1816_s17, %s1817_s7  }
0x195c   :  { %1808 = dma.done.wait [#allocation5], 1024  }
0x195d   :  { %1809 = vsyncadd [#allocation5], 4294966272 }
0x195e   :  { %1418 = vsyncpa [#allocation5], 1 }

</bundles_post_ra>
